<compile_context>
chip_gen: v5e
topology: v5e:2x2
jax: 0.10.0
libtpu: 0.0.40
codegen_flags: <defaults>
</compile_context>

<pallas_src>
import jax
import jax.numpy as jnp
from jax import lax
from jax.experimental import pallas as pl
from jax.experimental.pallas import tpu as pltpu

# ----------------------------- model config ---------------------------------
HIDDEN     = 128          # spanbert hidden_size (small synthetic version)
NUM_HEADS  = 2
HEAD_DIM   = HIDDEN // NUM_HEADS
FFN_DIM    = 256
NUM_LAYERS = 2
VOCAB      = 128
MAX_POS    = 64           # max_bert_length analogue
LN_EPS     = 1e-12        # BERT layer-norm eps

T_PAD = 16                # padded sub-token length per BERT segment (mult. of 8)
N_PAD = 16                # padded number of word-start positions per segment
NEG_INF = -1e9


# ------------------------------ fused kernel ---------------------------------
def _add_ln(x, g, b):
    # LayerNorm over the hidden (lane) axis, statistics in f32.
    mu = jnp.mean(x, axis=-1, keepdims=True)
    var = jnp.mean(jnp.square(x - mu), axis=-1, keepdims=True)
    return (x - mu) * lax.rsqrt(var + LN_EPS) * g + b


def fused_bert_kernel(ids_ref, idx_ref, mask_ref, pos_type_ref,
                      word_emb_ref, emb_g_ref, emb_b_ref,
                      wqkv_ref, bqkv_ref, wo_ref, bo_ref,
                      ln1_g_ref, ln1_b_ref,
                      w1_ref, b1_ref, w2_ref, b2_ref,
                      ln2_g_ref, ln2_b_ref,
                      out_ref):
    # ---- per-segment inputs (grid axis 0 = segment, handled by BlockSpec) ----
    ids = ids_ref[0]            # [T_PAD, 1] int32 (padded with 0)
    mask = mask_ref[0]          # [1, T_PAD] additive attention mask (0 / -1e9)

    # ---- word-embedding lookup: one-hot MXU matmul (no scalar gather loop) ---
    vocab_iota = lax.broadcasted_iota(jnp.int32, (T_PAD, VOCAB), 1)
    onehot_ids = (ids == vocab_iota).astype(jnp.bfloat16)          # [T_PAD, VOCAB]
    word = jnp.dot(onehot_ids, word_emb_ref[...],
                   preferred_element_type=jnp.float32)             # [T_PAD, H]
    h = _add_ln(word + pos_type_ref[...], emb_g_ref[...], emb_b_ref[...])

    scale = 1.0 / (HEAD_DIM ** 0.5)

    # ---- transformer layers (statically unrolled; weights resident in VMEM) --
    for l in range(NUM_LAYERS):
        hb = h.astype(jnp.bfloat16)
        # fused QKV projection: one [T,H] x [H,3H] matmul
        qkv = jnp.dot(hb, wqkv_ref[l],
                      preferred_element_type=jnp.float32) + bqkv_ref[l]
        q = qkv[:, 0 * HIDDEN:1 * HIDDEN]
        k = qkv[:, 1 * HIDDEN:2 * HIDDEN]
        v = qkv[:, 2 * HIDDEN:3 * HIDDEN]

        ctx_heads = []
        for hh in range(NUM_HEADS):
            lo, hi = hh * HEAD_DIM, (hh + 1) * HEAD_DIM
            qh = q[:, lo:hi].astype(jnp.bfloat16)
            kh = k[:, lo:hi].astype(jnp.bfloat16)
            vh = v[:, lo:hi].astype(jnp.bfloat16)
            # scores = q @ k^T (contract head_dim of both), f32 accumulate
            s = lax.dot_general(qh, kh, (((1,), (1,)), ((), ())),
                                preferred_element_type=jnp.float32)
            s = s * scale + mask                      # mask padded keys
            m = jnp.max(s, axis=-1, keepdims=True)
            p = jnp.exp(s - m)
            denom = jnp.sum(p, axis=-1, keepdims=True)
            p = p * pl.reciprocal(denom, approx=True)  # EUP, frees VALU
            ctx_heads.append(jnp.dot(p.astype(jnp.bfloat16), vh,
                                     preferred_element_type=jnp.float32))
        ctx = jnp.concatenate(ctx_heads, axis=-1).astype(jnp.bfloat16)  # [T, H]

        attn_out = jnp.dot(ctx, wo_ref[l],
                           preferred_element_type=jnp.float32) + bo_ref[l]
        h = _add_ln(h + attn_out, ln1_g_ref[l], ln1_b_ref[l])

        hid = jnp.dot(h.astype(jnp.bfloat16), w1_ref[l],
                      preferred_element_type=jnp.float32) + b1_ref[l]
        # TODO(synk): BERT uses exact erf-GELU; tanh approximation used here (EUP-friendly).
        hid = jax.nn.gelu(hid, approximate=True)
        ffn_out = jnp.dot(hid.astype(jnp.bfloat16), w2_ref[l],
                          preferred_element_type=jnp.float32) + b2_ref[l]
        h = _add_ln(h + ffn_out, ln2_g_ref[l], ln2_b_ref[l])

    # ---- torch.index_select(outputs, 1, orig_to_tok_map): one-hot MXU gather --
    idx = idx_ref[0]                                           # [N_PAD, 1] int32
    tok_iota = lax.broadcasted_iota(jnp.int32, (N_PAD, T_PAD), 1)
    onehot_idx = (idx == tok_iota).astype(jnp.float32)         # exact f32 select
    gathered = jnp.dot(onehot_idx, h, preferred_element_type=jnp.float32)
    out_ref[0] = gathered.astype(out_ref.dtype)


# ----------------------------- kernel wrapper ---------------------------------
def fused_bert_forward(params, ids_padded, idx_padded, attn_mask):
    """ids_padded int32[S,T_PAD,1], idx_padded int32[S,N_PAD,1],
    attn_mask f32[S,1,T_PAD] -> f32[S, N_PAD, H] word-start hidden states."""
    S = ids_padded.shape[0]
    pos_type = params["pos_emb"][:T_PAD] + params["type_emb"]   # [T_PAD, H] glue add

    const2 = lambda s: (0, 0)
    const3 = lambda s: (0, 0, 0)
    per_seg = lambda s: (s, 0, 0)

    grid_spec = pltpu.PrefetchScalarGridSpec(
        num_scalar_prefetch=0,
        grid=(S,),
        in_specs=[
            pl.BlockSpec((1, T_PAD, 1), per_seg),                       # ids
            pl.BlockSpec((1, N_PAD, 1), per_seg),                       # idx
            pl.BlockSpec((1, 1, T_PAD), per_seg),                       # attn mask
            pl.BlockSpec((T_PAD, HIDDEN), const2),                      # pos+type emb
            pl.BlockSpec((VOCAB, HIDDEN), const2),                      # word_emb
            pl.BlockSpec((1, HIDDEN), const2),                          # emb_ln_g
            pl.BlockSpec((1, HIDDEN), const2),                          # emb_ln_b
            pl.BlockSpec((NUM_LAYERS, HIDDEN, 3 * HIDDEN), const3),     # wqkv
            pl.BlockSpec((NUM_LAYERS, 1, 3 * HIDDEN), const3),          # bqkv
            pl.BlockSpec((NUM_LAYERS, HIDDEN, HIDDEN), const3),         # wo
            pl.BlockSpec((NUM_LAYERS, 1, HIDDEN), const3),              # bo
            pl.BlockSpec((NUM_LAYERS, 1, HIDDEN), const3),              # ln1_g
            pl.BlockSpec((NUM_LAYERS, 1, HIDDEN), const3),              # ln1_b
            pl.BlockSpec((NUM_LAYERS, HIDDEN, FFN_DIM), const3),        # w1
            pl.BlockSpec((NUM_LAYERS, 1, FFN_DIM), const3),             # b1
            pl.BlockSpec((NUM_LAYERS, FFN_DIM, HIDDEN), const3),        # w2
            pl.BlockSpec((NUM_LAYERS, 1, HIDDEN), const3),              # b2
            pl.BlockSpec((NUM_LAYERS, 1, HIDDEN), const3),              # ln2_g
            pl.BlockSpec((NUM_LAYERS, 1, HIDDEN), const3),              # ln2_b
        ],
        out_specs=pl.BlockSpec((1, N_PAD, HIDDEN), per_seg),
    )

    return pl.pallas_call(
        fused_bert_kernel,
        out_shape=jax.ShapeDtypeStruct((S, N_PAD, HIDDEN), jnp.float32),
        grid_spec=grid_spec,
        compiler_params=pltpu.CompilerParams(
            dimension_semantics=("parallel",)),   # 2 segments -> 2 TCs on v7x
    )(ids_padded, idx_padded, attn_mask, pos_type,
      params["word_emb"], params["emb_ln_g"], params["emb_ln_b"],
      params["wqkv"], params["bqkv"], params["wo"], params["bo"],
      params["ln1_g"], params["ln1_b"],
      params["w1"], params["b1"], params["w2"], params["b2"],
      params["ln2_g"], params["ln2_b"])


# -------------------- WrapperSpanBERTSubtoken.forward -------------------------
def wrapper_spanbert_subtoken_forward(params, ids_padded, idx_padded,
                                      attn_mask, n_words):
    """Mirrors: for each segment run BERT, index_select word-start sub-tokens,
    then torch.cat(rep, 1) -> [1, n_words_total, H]."""
    out = fused_bert_forward(params, ids_padded, idx_padded, attn_mask)
    rep = [out[i, :n] for i, n in enumerate(n_words)]   # drop gather padding
    return jnp.concatenate(rep, axis=0)[None]           # [1, n_words_total, H]


# ----------------------------- parameters ------------------------------------
def init_params(key):
    def nrm(k, shape, scale=0.02, dtype=jnp.bfloat16):
        return (scale * jax.random.normal(k, shape, dtype=jnp.float32)).astype(dtype)

    keys = iter(jax.random.split(key, 16))
    L = NUM_LAYERS
    return {
        # bf16 weights feed the MXU directly (f32 accumulate in-kernel)
        "word_emb": nrm(next(keys), (VOCAB, HIDDEN)),
        "pos_emb":  nrm(next(keys), (MAX_POS, HIDDEN), dtype=jnp.float32),
        "type_emb": nrm(next(keys), (1, HIDDEN), dtype=jnp.float32),
        "emb_ln_g": jnp.ones((1, HIDDEN), jnp.float32),
        "emb_ln_b": jnp.zeros((1, HIDDEN), jnp.float32),
        "wqkv": nrm(next(keys), (L, HIDDEN, 3 * HIDDEN)),
        "bqkv": jnp.zeros((L, 1, 3 * HIDDEN), jnp.float32),
        "wo":   nrm(next(keys), (L, HIDDEN, HIDDEN)),
        "bo":   jnp.zeros((L, 1, HIDDEN), jnp.float32),
        "ln1_g": jnp.ones((L, 1, HIDDEN), jnp.float32),
        "ln1_b": jnp.zeros((L, 1, HIDDEN), jnp.float32),
        "w1":   nrm(next(keys), (L, HIDDEN, FFN_DIM)),
        "b1":   jnp.zeros((L, 1, FFN_DIM), jnp.float32),
        "w2":   nrm(next(keys), (L, FFN_DIM, HIDDEN)),
        "b2":   jnp.zeros((L, 1, HIDDEN), jnp.float32),
        "ln2_g": jnp.ones((L, 1, HIDDEN), jnp.float32),
        "ln2_b": jnp.zeros((L, 1, HIDDEN), jnp.float32),
    }


# --------------------------------- main ---------------------------------------
if __name__ == "__main__":
    key = jax.random.PRNGKey(0)
    pkey, k1, k2 = jax.random.split(key, 3)
    params = init_params(pkey)

    # Two synthetic BERT segments of the single input text (ids already include
    # [CLS]=1 at position 0 and [SEP]=2 at the end; real tokenization is
    # outside tensor land).
    ids1 = jax.random.randint(k1, (16,), 5, VOCAB, dtype=jnp.int32)
    ids1 = ids1.at[0].set(1).at[-1].set(2)
    map1 = jnp.array([1, 2, 4, 5, 7, 9, 10, 12, 13, 14], dtype=jnp.int32)

    ids2 = jax.random.randint(k2, (12,), 5, VOCAB, dtype=jnp.int32)
    ids2 = ids2.at[0].set(1).at[-1].set(2)
    map2 = jnp.array([1, 3, 4, 6, 8, 9, 10], dtype=jnp.int32)

    seg_ids = [ids1, ids2]
    seg_maps = [map1, map2]
    seq_lens = [int(x.shape[0]) for x in seg_ids]
    n_words = [int(m.shape[0]) for m in seg_maps]
    S = len(seg_ids)

    # Pad segments to a common static (sublane-aligned) shape + attention mask.
    ids_padded = jnp.zeros((S, T_PAD, 1), jnp.int32)
    idx_padded = jnp.zeros((S, N_PAD, 1), jnp.int32)
    attn_mask = jnp.zeros((S, 1, T_PAD), jnp.float32)
    for i in range(S):
        ids_padded = ids_padded.at[i, :seq_lens[i], 0].set(seg_ids[i])
        idx_padded = idx_padded.at[i, :n_words[i], 0].set(seg_maps[i])
        attn_mask = attn_mask.at[i, 0, seq_lens[i]:].set(NEG_INF)

    out = wrapper_spanbert_subtoken_forward(params, ids_padded, idx_padded,
                                            attn_mask, n_words)
    out = jax.block_until_ready(out)

    assert out.shape == (1, sum(n_words), HIDDEN), out.shape
    assert bool(jnp.all(jnp.isfinite(out)))
    print("KERNEL_OK")
</pallas_src>

<mosaic_0001>
module attributes {stable_mosaic.version = 11 : i64} {
  func.func @fused_bert_kernel(%arg0: i32, %arg1: memref<1x16x1xi32, #tpu.memory_space<vmem>>, %arg2: memref<1x16x1xi32, #tpu.memory_space<vmem>>, %arg3: memref<1x1x16xf32, #tpu.memory_space<vmem>>, %arg4: memref<16x128xf32, #tpu.memory_space<vmem>>, %arg5: memref<128x128xbf16, #tpu.memory_space<vmem>>, %arg6: memref<1x128xf32, #tpu.memory_space<vmem>>, %arg7: memref<1x128xf32, #tpu.memory_space<vmem>>, %arg8: memref<2x128x384xbf16, #tpu.memory_space<vmem>>, %arg9: memref<2x1x384xf32, #tpu.memory_space<vmem>>, %arg10: memref<2x128x128xbf16, #tpu.memory_space<vmem>>, %arg11: memref<2x1x128xf32, #tpu.memory_space<vmem>>, %arg12: memref<2x1x128xf32, #tpu.memory_space<vmem>>, %arg13: memref<2x1x128xf32, #tpu.memory_space<vmem>>, %arg14: memref<2x128x256xbf16, #tpu.memory_space<vmem>>, %arg15: memref<2x1x256xf32, #tpu.memory_space<vmem>>, %arg16: memref<2x256x128xbf16, #tpu.memory_space<vmem>>, %arg17: memref<2x1x128xf32, #tpu.memory_space<vmem>>, %arg18: memref<2x1x128xf32, #tpu.memory_space<vmem>>, %arg19: memref<2x1x128xf32, #tpu.memory_space<vmem>>, %arg20: memref<1x16x128xf32, #tpu.memory_space<vmem>>) attributes {dimension_semantics = [#tpu.dimension_semantics<parallel>], iteration_bounds = array<i64: 2>, scalar_prefetch = 0 : i64, scratch_operands = 0 : i64, tpu.core_type = #tpu.core_type<tc>, window_params = [{transform_indices = @transform_0, window_bounds = array<i64: 1, 16, 1>}, {transform_indices = @transform_1, window_bounds = array<i64: 1, 16, 1>}, {transform_indices = @transform_2, window_bounds = array<i64: 1, 1, 16>}, {pipeline_mode = #tpu.pipeline_mode<synchronous>, transform_indices = @transform_3, window_bounds = array<i64: 16, 128>}, {pipeline_mode = #tpu.pipeline_mode<synchronous>, transform_indices = @transform_4, window_bounds = array<i64: 128, 128>}, {pipeline_mode = #tpu.pipeline_mode<synchronous>, transform_indices = @transform_5, window_bounds = array<i64: 1, 128>}, {pipeline_mode = #tpu.pipeline_mode<synchronous>, transform_indices = @transform_6, window_bounds = array<i64: 1, 128>}, {pipeline_mode = #tpu.pipeline_mode<synchronous>, transform_indices = @transform_7, window_bounds = array<i64: 2, 128, 384>}, {pipeline_mode = #tpu.pipeline_mode<synchronous>, transform_indices = @transform_8, window_bounds = array<i64: 2, 1, 384>}, {pipeline_mode = #tpu.pipeline_mode<synchronous>, transform_indices = @transform_9, window_bounds = array<i64: 2, 128, 128>}, {pipeline_mode = #tpu.pipeline_mode<synchronous>, transform_indices = @transform_10, window_bounds = array<i64: 2, 1, 128>}, {pipeline_mode = #tpu.pipeline_mode<synchronous>, transform_indices = @transform_11, window_bounds = array<i64: 2, 1, 128>}, {pipeline_mode = #tpu.pipeline_mode<synchronous>, transform_indices = @transform_12, window_bounds = array<i64: 2, 1, 128>}, {pipeline_mode = #tpu.pipeline_mode<synchronous>, transform_indices = @transform_13, window_bounds = array<i64: 2, 128, 256>}, {pipeline_mode = #tpu.pipeline_mode<synchronous>, transform_indices = @transform_14, window_bounds = array<i64: 2, 1, 256>}, {pipeline_mode = #tpu.pipeline_mode<synchronous>, transform_indices = @transform_15, window_bounds = array<i64: 2, 256, 128>}, {pipeline_mode = #tpu.pipeline_mode<synchronous>, transform_indices = @transform_16, window_bounds = array<i64: 2, 1, 128>}, {pipeline_mode = #tpu.pipeline_mode<synchronous>, transform_indices = @transform_17, window_bounds = array<i64: 2, 1, 128>}, {pipeline_mode = #tpu.pipeline_mode<synchronous>, transform_indices = @transform_18, window_bounds = array<i64: 2, 1, 128>}, {transform_indices = @transform_19, window_bounds = array<i64: 1, 16, 128>}]} {
    %c0 = arith.constant 0 : index
    %c0_0 = arith.constant 0 : index
    %c0_1 = arith.constant 0 : index
    %0 = vector.load %arg1[%c0, %c0_0, %c0_1] : memref<1x16x1xi32, #tpu.memory_space<vmem>>, vector<1x16x1xi32>
    %1 = vector.shape_cast %0 : vector<1x16x1xi32> to vector<16x1xi32>
    %c0_2 = arith.constant 0 : index
    %c0_3 = arith.constant 0 : index
    %c0_4 = arith.constant 0 : index
    %2 = vector.load %arg3[%c0_2, %c0_3, %c0_4] : memref<1x1x16xf32, #tpu.memory_space<vmem>>, vector<1x1x16xf32>
    %3 = vector.shape_cast %2 : vector<1x1x16xf32> to vector<1x16xf32>
    %4 = tpu.iota {dimensions = array<i32: 1>} : vector<16x128xi32>
    %5 = vector.broadcast %1 : vector<16x1xi32> to vector<16x128xi32>
    %6 = arith.cmpi eq, %5, %4 : vector<16x128xi32>
    %7 = arith.extui %6 : vector<16x128xi1> to vector<16x128xi32>
    %8 = arith.sitofp %7 : vector<16x128xi32> to vector<16x128xf32>
    %9 = arith.truncf %8 : vector<16x128xf32> to vector<16x128xbf16>
    %c0_5 = arith.constant 0 : index
    %c0_6 = arith.constant 0 : index
    %10 = vector.load %arg5[%c0_5, %c0_6] : memref<128x128xbf16, #tpu.memory_space<vmem>>, vector<128x128xbf16>
    %cst = arith.constant dense<0.000000e+00> : vector<16x128xf32>
    %11 = tpu.matmul %9, %10, %cst {dimension_numbers = #tpu.dot_dimension_numbers<[1], [0], [0], [1], [0, 0, 1, 1], [], []>} : vector<16x128xbf16>, vector<128x128xbf16>, vector<16x128xf32> -> vector<16x128xf32>
    %c0_7 = arith.constant 0 : index
    %c0_8 = arith.constant 0 : index
    %12 = vector.load %arg4[%c0_7, %c0_8] : memref<16x128xf32, #tpu.memory_space<vmem>>, vector<16x128xf32>
    %13 = arith.addf %11, %12 : vector<16x128xf32>
    %c0_9 = arith.constant 0 : index
    %c0_10 = arith.constant 0 : index
    %14 = vector.load %arg6[%c0_9, %c0_10] : memref<1x128xf32, #tpu.memory_space<vmem>>, vector<1x128xf32>
    %c0_11 = arith.constant 0 : index
    %c0_12 = arith.constant 0 : index
    %15 = vector.load %arg7[%c0_11, %c0_12] : memref<1x128xf32, #tpu.memory_space<vmem>>, vector<1x128xf32>
    %cst_13 = arith.constant dense<0.000000e+00> : vector<16xf32>
    %16 = vector.multi_reduction <add>, %13, %cst_13 [1] : vector<16x128xf32> to vector<16xf32>
    %17 = vector.shape_cast %16 : vector<16xf32> to vector<16x1xf32>
    %cst_14 = arith.constant 1.280000e+02 : f32
    %18 = vector.broadcast %cst_14 : f32 to vector<16x1xf32>
    %19 = arith.divf %17, %18 : vector<16x1xf32>
    %20 = vector.broadcast %19 : vector<16x1xf32> to vector<16x128xf32>
    %21 = arith.subf %13, %20 : vector<16x128xf32>
    %22 = arith.mulf %21, %21 : vector<16x128xf32>
    %cst_15 = arith.constant dense<0.000000e+00> : vector<16xf32>
    %23 = vector.multi_reduction <add>, %22, %cst_15 [1] : vector<16x128xf32> to vector<16xf32>
    %24 = vector.shape_cast %23 : vector<16xf32> to vector<16x1xf32>
    %cst_16 = arith.constant 1.280000e+02 : f32
    %25 = vector.broadcast %cst_16 : f32 to vector<16x1xf32>
    %26 = arith.divf %24, %25 : vector<16x1xf32>
    %27 = vector.broadcast %19 : vector<16x1xf32> to vector<16x128xf32>
    %28 = arith.subf %13, %27 : vector<16x128xf32>
    %cst_17 = arith.constant 9.99999996E-13 : f32
    %29 = vector.broadcast %cst_17 : f32 to vector<16x1xf32>
    %30 = arith.addf %26, %29 : vector<16x1xf32>
    %31 = math.rsqrt %30 : vector<16x1xf32>
    %32 = vector.broadcast %31 : vector<16x1xf32> to vector<16x128xf32>
    %33 = arith.mulf %28, %32 : vector<16x128xf32>
    %34 = vector.broadcast %14 : vector<1x128xf32> to vector<16x128xf32>
    %35 = arith.mulf %33, %34 : vector<16x128xf32>
    %36 = vector.broadcast %15 : vector<1x128xf32> to vector<16x128xf32>
    %37 = arith.addf %35, %36 : vector<16x128xf32>
    %38 = arith.truncf %37 : vector<16x128xf32> to vector<16x128xbf16>
    %c0_18 = arith.constant 0 : index
    %c0_19 = arith.constant 0 : index
    %c0_20 = arith.constant 0 : index
    %39 = vector.load %arg8[%c0_18, %c0_19, %c0_20] : memref<2x128x384xbf16, #tpu.memory_space<vmem>>, vector<1x128x384xbf16>
    %40 = vector.shape_cast %39 : vector<1x128x384xbf16> to vector<128x384xbf16>
    %cst_21 = arith.constant dense<0.000000e+00> : vector<16x384xf32>
    %41 = tpu.matmul %38, %40, %cst_21 {dimension_numbers = #tpu.dot_dimension_numbers<[1], [0], [0], [1], [0, 0, 1, 1], [], []>} : vector<16x128xbf16>, vector<128x384xbf16>, vector<16x384xf32> -> vector<16x384xf32>
    %c0_22 = arith.constant 0 : index
    %c0_23 = arith.constant 0 : index
    %c0_24 = arith.constant 0 : index
    %42 = vector.load %arg9[%c0_22, %c0_23, %c0_24] : memref<2x1x384xf32, #tpu.memory_space<vmem>>, vector<1x1x384xf32>
    %43 = vector.shape_cast %42 : vector<1x1x384xf32> to vector<1x384xf32>
    %44 = vector.broadcast %43 : vector<1x384xf32> to vector<16x384xf32>
    %45 = arith.addf %41, %44 : vector<16x384xf32>
    %46 = vector.extract_strided_slice %45 {offsets = [0, 0], sizes = [16, 128], strides = [1, 1]} : vector<16x384xf32> to vector<16x128xf32>
    %47 = vector.extract_strided_slice %45 {offsets = [0, 128], sizes = [16, 128], strides = [1, 1]} : vector<16x384xf32> to vector<16x128xf32>
    %48 = vector.extract_strided_slice %45 {offsets = [0, 256], sizes = [16, 128], strides = [1, 1]} : vector<16x384xf32> to vector<16x128xf32>
    %49 = vector.extract_strided_slice %46 {offsets = [0, 0], sizes = [16, 64], strides = [1, 1]} : vector<16x128xf32> to vector<16x64xf32>
    %50 = arith.truncf %49 : vector<16x64xf32> to vector<16x64xbf16>
    %51 = vector.extract_strided_slice %47 {offsets = [0, 0], sizes = [16, 64], strides = [1, 1]} : vector<16x128xf32> to vector<16x64xf32>
    %52 = arith.truncf %51 : vector<16x64xf32> to vector<16x64xbf16>
    %53 = vector.extract_strided_slice %48 {offsets = [0, 0], sizes = [16, 64], strides = [1, 1]} : vector<16x128xf32> to vector<16x64xf32>
    %54 = arith.truncf %53 : vector<16x64xf32> to vector<16x64xbf16>
    %cst_25 = arith.constant dense<0.000000e+00> : vector<16x16xf32>
    %55 = tpu.matmul %50, %52, %cst_25 {dimension_numbers = #tpu.dot_dimension_numbers<[1], [1], [0], [0], [0, 0, 1, 0], [], []>} : vector<16x64xbf16>, vector<16x64xbf16>, vector<16x16xf32> -> vector<16x16xf32>
    %cst_26 = arith.constant 1.250000e-01 : f32
    %56 = vector.broadcast %cst_26 : f32 to vector<16x16xf32>
    %57 = arith.mulf %55, %56 : vector<16x16xf32>
    %58 = vector.broadcast %3 : vector<1x16xf32> to vector<16x16xf32>
    %59 = arith.addf %57, %58 : vector<16x16xf32>
    %cst_27 = arith.constant dense<0xFF800000> : vector<16xf32>
    %60 = vector.multi_reduction <maximumf>, %59, %cst_27 [1] : vector<16x16xf32> to vector<16xf32>
    %61 = vector.shape_cast %60 : vector<16xf32> to vector<16x1xf32>
    %62 = vector.broadcast %61 : vector<16x1xf32> to vector<16x16xf32>
    %63 = arith.subf %59, %62 : vector<16x16xf32>
    %64 = math.exp %63 : vector<16x16xf32>
    %cst_28 = arith.constant dense<0.000000e+00> : vector<16xf32>
    %65 = vector.multi_reduction <add>, %64, %cst_28 [1] : vector<16x16xf32> to vector<16xf32>
    %66 = vector.shape_cast %65 : vector<16xf32> to vector<16x1xf32>
    %67 = tpu.reciprocal %66 {approx = true} : vector<16x1xf32> -> vector<16x1xf32>
    %68 = vector.broadcast %67 : vector<16x1xf32> to vector<16x16xf32>
    %69 = arith.mulf %64, %68 : vector<16x16xf32>
    %70 = arith.truncf %69 : vector<16x16xf32> to vector<16x16xbf16>
    %cst_29 = arith.constant dense<0.000000e+00> : vector<16x64xf32>
    %71 = tpu.matmul %70, %54, %cst_29 {dimension_numbers = #tpu.dot_dimension_numbers<[1], [0], [0], [1], [0, 0, 1, 1], [], []>} : vector<16x16xbf16>, vector<16x64xbf16>, vector<16x64xf32> -> vector<16x64xf32>
    %72 = vector.extract_strided_slice %46 {offsets = [0, 64], sizes = [16, 64], strides = [1, 1]} : vector<16x128xf32> to vector<16x64xf32>
    %73 = arith.truncf %72 : vector<16x64xf32> to vector<16x64xbf16>
    %74 = vector.extract_strided_slice %47 {offsets = [0, 64], sizes = [16, 64], strides = [1, 1]} : vector<16x128xf32> to vector<16x64xf32>
    %75 = arith.truncf %74 : vector<16x64xf32> to vector<16x64xbf16>
    %76 = vector.extract_strided_slice %48 {offsets = [0, 64], sizes = [16, 64], strides = [1, 1]} : vector<16x128xf32> to vector<16x64xf32>
    %77 = arith.truncf %76 : vector<16x64xf32> to vector<16x64xbf16>
    %cst_30 = arith.constant dense<0.000000e+00> : vector<16x16xf32>
    %78 = tpu.matmul %73, %75, %cst_30 {dimension_numbers = #tpu.dot_dimension_numbers<[1], [1], [0], [0], [0, 0, 1, 0], [], []>} : vector<16x64xbf16>, vector<16x64xbf16>, vector<16x16xf32> -> vector<16x16xf32>
    %cst_31 = arith.constant 1.250000e-01 : f32
    %79 = vector.broadcast %cst_31 : f32 to vector<16x16xf32>
    %80 = arith.mulf %78, %79 : vector<16x16xf32>
    %81 = vector.broadcast %3 : vector<1x16xf32> to vector<16x16xf32>
    %82 = arith.addf %80, %81 : vector<16x16xf32>
    %cst_32 = arith.constant dense<0xFF800000> : vector<16xf32>
    %83 = vector.multi_reduction <maximumf>, %82, %cst_32 [1] : vector<16x16xf32> to vector<16xf32>
    %84 = vector.shape_cast %83 : vector<16xf32> to vector<16x1xf32>
    %85 = vector.broadcast %84 : vector<16x1xf32> to vector<16x16xf32>
    %86 = arith.subf %82, %85 : vector<16x16xf32>
    %87 = math.exp %86 : vector<16x16xf32>
    %cst_33 = arith.constant dense<0.000000e+00> : vector<16xf32>
    %88 = vector.multi_reduction <add>, %87, %cst_33 [1] : vector<16x16xf32> to vector<16xf32>
    %89 = vector.shape_cast %88 : vector<16xf32> to vector<16x1xf32>
    %90 = tpu.reciprocal %89 {approx = true} : vector<16x1xf32> -> vector<16x1xf32>
    %91 = vector.broadcast %90 : vector<16x1xf32> to vector<16x16xf32>
    %92 = arith.mulf %87, %91 : vector<16x16xf32>
    %93 = arith.truncf %92 : vector<16x16xf32> to vector<16x16xbf16>
    %cst_34 = arith.constant dense<0.000000e+00> : vector<16x64xf32>
    %94 = tpu.matmul %93, %77, %cst_34 {dimension_numbers = #tpu.dot_dimension_numbers<[1], [0], [0], [1], [0, 0, 1, 1], [], []>} : vector<16x16xbf16>, vector<16x64xbf16>, vector<16x64xf32> -> vector<16x64xf32>
    %95 = tpu.concatenate %71, %94 in 1 : vector<16x64xf32>, vector<16x64xf32> -> vector<16x128xf32>
    %96 = arith.truncf %95 : vector<16x128xf32> to vector<16x128xbf16>
    %c0_35 = arith.constant 0 : index
    %c0_36 = arith.constant 0 : index
    %c0_37 = arith.constant 0 : index
    %97 = vector.load %arg10[%c0_35, %c0_36, %c0_37] : memref<2x128x128xbf16, #tpu.memory_space<vmem>>, vector<1x128x128xbf16>
    %98 = vector.shape_cast %97 : vector<1x128x128xbf16> to vector<128x128xbf16>
    %cst_38 = arith.constant dense<0.000000e+00> : vector<16x128xf32>
    %99 = tpu.matmul %96, %98, %cst_38 {dimension_numbers = #tpu.dot_dimension_numbers<[1], [0], [0], [1], [0, 0, 1, 1], [], []>} : vector<16x128xbf16>, vector<128x128xbf16>, vector<16x128xf32> -> vector<16x128xf32>
    %c0_39 = arith.constant 0 : index
    %c0_40 = arith.constant 0 : index
    %c0_41 = arith.constant 0 : index
    %100 = vector.load %arg11[%c0_39, %c0_40, %c0_41] : memref<2x1x128xf32, #tpu.memory_space<vmem>>, vector<1x1x128xf32>
    %101 = vector.shape_cast %100 : vector<1x1x128xf32> to vector<1x128xf32>
    %102 = vector.broadcast %101 : vector<1x128xf32> to vector<16x128xf32>
    %103 = arith.addf %99, %102 : vector<16x128xf32>
    %104 = arith.addf %37, %103 : vector<16x128xf32>
    %c0_42 = arith.constant 0 : index
    %c0_43 = arith.constant 0 : index
    %c0_44 = arith.constant 0 : index
    %105 = vector.load %arg12[%c0_42, %c0_43, %c0_44] : memref<2x1x128xf32, #tpu.memory_space<vmem>>, vector<1x1x128xf32>
    %106 = vector.shape_cast %105 : vector<1x1x128xf32> to vector<1x128xf32>
    %c0_45 = arith.constant 0 : index
    %c0_46 = arith.constant 0 : index
    %c0_47 = arith.constant 0 : index
    %107 = vector.load %arg13[%c0_45, %c0_46, %c0_47] : memref<2x1x128xf32, #tpu.memory_space<vmem>>, vector<1x1x128xf32>
    %108 = vector.shape_cast %107 : vector<1x1x128xf32> to vector<1x128xf32>
    %cst_48 = arith.constant dense<0.000000e+00> : vector<16xf32>
    %109 = vector.multi_reduction <add>, %104, %cst_48 [1] : vector<16x128xf32> to vector<16xf32>
    %110 = vector.shape_cast %109 : vector<16xf32> to vector<16x1xf32>
    %cst_49 = arith.constant 1.280000e+02 : f32
    %111 = vector.broadcast %cst_49 : f32 to vector<16x1xf32>
    %112 = arith.divf %110, %111 : vector<16x1xf32>
    %113 = vector.broadcast %112 : vector<16x1xf32> to vector<16x128xf32>
    %114 = arith.subf %104, %113 : vector<16x128xf32>
    %115 = arith.mulf %114, %114 : vector<16x128xf32>
    %cst_50 = arith.constant dense<0.000000e+00> : vector<16xf32>
    %116 = vector.multi_reduction <add>, %115, %cst_50 [1] : vector<16x128xf32> to vector<16xf32>
    %117 = vector.shape_cast %116 : vector<16xf32> to vector<16x1xf32>
    %cst_51 = arith.constant 1.280000e+02 : f32
    %118 = vector.broadcast %cst_51 : f32 to vector<16x1xf32>
    %119 = arith.divf %117, %118 : vector<16x1xf32>
    %120 = vector.broadcast %112 : vector<16x1xf32> to vector<16x128xf32>
    %121 = arith.subf %104, %120 : vector<16x128xf32>
    %cst_52 = arith.constant 9.99999996E-13 : f32
    %122 = vector.broadcast %cst_52 : f32 to vector<16x1xf32>
    %123 = arith.addf %119, %122 : vector<16x1xf32>
    %124 = math.rsqrt %123 : vector<16x1xf32>
    %125 = vector.broadcast %124 : vector<16x1xf32> to vector<16x128xf32>
    %126 = arith.mulf %121, %125 : vector<16x128xf32>
    %127 = vector.broadcast %106 : vector<1x128xf32> to vector<16x128xf32>
    %128 = arith.mulf %126, %127 : vector<16x128xf32>
    %129 = vector.broadcast %108 : vector<1x128xf32> to vector<16x128xf32>
    %130 = arith.addf %128, %129 : vector<16x128xf32>
    %131 = arith.truncf %130 : vector<16x128xf32> to vector<16x128xbf16>
    %c0_53 = arith.constant 0 : index
    %c0_54 = arith.constant 0 : index
    %c0_55 = arith.constant 0 : index
    %132 = vector.load %arg14[%c0_53, %c0_54, %c0_55] : memref<2x128x256xbf16, #tpu.memory_space<vmem>>, vector<1x128x256xbf16>
    %133 = vector.shape_cast %132 : vector<1x128x256xbf16> to vector<128x256xbf16>
    %cst_56 = arith.constant dense<0.000000e+00> : vector<16x256xf32>
    %134 = tpu.matmul %131, %133, %cst_56 {dimension_numbers = #tpu.dot_dimension_numbers<[1], [0], [0], [1], [0, 0, 1, 1], [], []>} : vector<16x128xbf16>, vector<128x256xbf16>, vector<16x256xf32> -> vector<16x256xf32>
    %c0_57 = arith.constant 0 : index
    %c0_58 = arith.constant 0 : index
    %c0_59 = arith.constant 0 : index
    %135 = vector.load %arg15[%c0_57, %c0_58, %c0_59] : memref<2x1x256xf32, #tpu.memory_space<vmem>>, vector<1x1x256xf32>
    %136 = vector.shape_cast %135 : vector<1x1x256xf32> to vector<1x256xf32>
    %137 = vector.broadcast %136 : vector<1x256xf32> to vector<16x256xf32>
    %138 = arith.addf %134, %137 : vector<16x256xf32>
    %139 = arith.mulf %138, %138 : vector<16x256xf32>
    %140 = arith.mulf %138, %139 : vector<16x256xf32>
    %cst_60 = arith.constant 4.471500e-02 : f32
    %141 = vector.broadcast %cst_60 : f32 to vector<16x256xf32>
    %142 = arith.mulf %141, %140 : vector<16x256xf32>
    %143 = arith.addf %138, %142 : vector<16x256xf32>
    %cst_61 = arith.constant 0.797884583 : f32
    %144 = vector.broadcast %cst_61 : f32 to vector<16x256xf32>
    %145 = arith.mulf %144, %143 : vector<16x256xf32>
    %146 = math.tanh %145 : vector<16x256xf32>
    %cst_62 = arith.constant 1.000000e+00 : f32
    %147 = vector.broadcast %cst_62 : f32 to vector<16x256xf32>
    %148 = arith.addf %147, %146 : vector<16x256xf32>
    %cst_63 = arith.constant 5.000000e-01 : f32
    %149 = vector.broadcast %cst_63 : f32 to vector<16x256xf32>
    %150 = arith.mulf %149, %148 : vector<16x256xf32>
    %151 = arith.mulf %138, %150 : vector<16x256xf32>
    %152 = arith.truncf %151 : vector<16x256xf32> to vector<16x256xbf16>
    %c0_64 = arith.constant 0 : index
    %c0_65 = arith.constant 0 : index
    %c0_66 = arith.constant 0 : index
    %153 = vector.load %arg16[%c0_64, %c0_65, %c0_66] : memref<2x256x128xbf16, #tpu.memory_space<vmem>>, vector<1x256x128xbf16>
    %154 = vector.shape_cast %153 : vector<1x256x128xbf16> to vector<256x128xbf16>
    %cst_67 = arith.constant dense<0.000000e+00> : vector<16x128xf32>
    %155 = tpu.matmul %152, %154, %cst_67 {dimension_numbers = #tpu.dot_dimension_numbers<[1], [0], [0], [1], [0, 0, 1, 1], [], []>} : vector<16x256xbf16>, vector<256x128xbf16>, vector<16x128xf32> -> vector<16x128xf32>
    %c0_68 = arith.constant 0 : index
    %c0_69 = arith.constant 0 : index
    %c0_70 = arith.constant 0 : index
    %156 = vector.load %arg17[%c0_68, %c0_69, %c0_70] : memref<2x1x128xf32, #tpu.memory_space<vmem>>, vector<1x1x128xf32>
    %157 = vector.shape_cast %156 : vector<1x1x128xf32> to vector<1x128xf32>
    %158 = vector.broadcast %157 : vector<1x128xf32> to vector<16x128xf32>
    %159 = arith.addf %155, %158 : vector<16x128xf32>
    %160 = arith.addf %130, %159 : vector<16x128xf32>
    %c0_71 = arith.constant 0 : index
    %c0_72 = arith.constant 0 : index
    %c0_73 = arith.constant 0 : index
    %161 = vector.load %arg18[%c0_71, %c0_72, %c0_73] : memref<2x1x128xf32, #tpu.memory_space<vmem>>, vector<1x1x128xf32>
    %162 = vector.shape_cast %161 : vector<1x1x128xf32> to vector<1x128xf32>
    %c0_74 = arith.constant 0 : index
    %c0_75 = arith.constant 0 : index
    %c0_76 = arith.constant 0 : index
    %163 = vector.load %arg19[%c0_74, %c0_75, %c0_76] : memref<2x1x128xf32, #tpu.memory_space<vmem>>, vector<1x1x128xf32>
    %164 = vector.shape_cast %163 : vector<1x1x128xf32> to vector<1x128xf32>
    %cst_77 = arith.constant dense<0.000000e+00> : vector<16xf32>
    %165 = vector.multi_reduction <add>, %160, %cst_77 [1] : vector<16x128xf32> to vector<16xf32>
    %166 = vector.shape_cast %165 : vector<16xf32> to vector<16x1xf32>
    %cst_78 = arith.constant 1.280000e+02 : f32
    %167 = vector.broadcast %cst_78 : f32 to vector<16x1xf32>
    %168 = arith.divf %166, %167 : vector<16x1xf32>
    %169 = vector.broadcast %168 : vector<16x1xf32> to vector<16x128xf32>
    %170 = arith.subf %160, %169 : vector<16x128xf32>
    %171 = arith.mulf %170, %170 : vector<16x128xf32>
    %cst_79 = arith.constant dense<0.000000e+00> : vector<16xf32>
    %172 = vector.multi_reduction <add>, %171, %cst_79 [1] : vector<16x128xf32> to vector<16xf32>
    %173 = vector.shape_cast %172 : vector<16xf32> to vector<16x1xf32>
    %cst_80 = arith.constant 1.280000e+02 : f32
    %174 = vector.broadcast %cst_80 : f32 to vector<16x1xf32>
    %175 = arith.divf %173, %174 : vector<16x1xf32>
    %176 = vector.broadcast %168 : vector<16x1xf32> to vector<16x128xf32>
    %177 = arith.subf %160, %176 : vector<16x128xf32>
    %cst_81 = arith.constant 9.99999996E-13 : f32
    %178 = vector.broadcast %cst_81 : f32 to vector<16x1xf32>
    %179 = arith.addf %175, %178 : vector<16x1xf32>
    %180 = math.rsqrt %179 : vector<16x1xf32>
    %181 = vector.broadcast %180 : vector<16x1xf32> to vector<16x128xf32>
    %182 = arith.mulf %177, %181 : vector<16x128xf32>
    %183 = vector.broadcast %162 : vector<1x128xf32> to vector<16x128xf32>
    %184 = arith.mulf %182, %183 : vector<16x128xf32>
    %185 = vector.broadcast %164 : vector<1x128xf32> to vector<16x128xf32>
    %186 = arith.addf %184, %185 : vector<16x128xf32>
    %187 = arith.truncf %186 : vector<16x128xf32> to vector<16x128xbf16>
    %c1 = arith.constant 1 : index
    %c0_82 = arith.constant 0 : index
    %c0_83 = arith.constant 0 : index
    %188 = vector.load %arg8[%c1, %c0_82, %c0_83] : memref<2x128x384xbf16, #tpu.memory_space<vmem>>, vector<1x128x384xbf16>
    %189 = vector.shape_cast %188 : vector<1x128x384xbf16> to vector<128x384xbf16>
    %cst_84 = arith.constant dense<0.000000e+00> : vector<16x384xf32>
    %190 = tpu.matmul %187, %189, %cst_84 {dimension_numbers = #tpu.dot_dimension_numbers<[1], [0], [0], [1], [0, 0, 1, 1], [], []>} : vector<16x128xbf16>, vector<128x384xbf16>, vector<16x384xf32> -> vector<16x384xf32>
    %c1_85 = arith.constant 1 : index
    %c0_86 = arith.constant 0 : index
    %c0_87 = arith.constant 0 : index
    %191 = vector.load %arg9[%c1_85, %c0_86, %c0_87] : memref<2x1x384xf32, #tpu.memory_space<vmem>>, vector<1x1x384xf32>
    %192 = vector.shape_cast %191 : vector<1x1x384xf32> to vector<1x384xf32>
    %193 = vector.broadcast %192 : vector<1x384xf32> to vector<16x384xf32>
    %194 = arith.addf %190, %193 : vector<16x384xf32>
    %195 = vector.extract_strided_slice %194 {offsets = [0, 0], sizes = [16, 128], strides = [1, 1]} : vector<16x384xf32> to vector<16x128xf32>
    %196 = vector.extract_strided_slice %194 {offsets = [0, 128], sizes = [16, 128], strides = [1, 1]} : vector<16x384xf32> to vector<16x128xf32>
    %197 = vector.extract_strided_slice %194 {offsets = [0, 256], sizes = [16, 128], strides = [1, 1]} : vector<16x384xf32> to vector<16x128xf32>
    %198 = vector.extract_strided_slice %195 {offsets = [0, 0], sizes = [16, 64], strides = [1, 1]} : vector<16x128xf32> to vector<16x64xf32>
    %199 = arith.truncf %198 : vector<16x64xf32> to vector<16x64xbf16>
    %200 = vector.extract_strided_slice %196 {offsets = [0, 0], sizes = [16, 64], strides = [1, 1]} : vector<16x128xf32> to vector<16x64xf32>
    %201 = arith.truncf %200 : vector<16x64xf32> to vector<16x64xbf16>
    %202 = vector.extract_strided_slice %197 {offsets = [0, 0], sizes = [16, 64], strides = [1, 1]} : vector<16x128xf32> to vector<16x64xf32>
    %203 = arith.truncf %202 : vector<16x64xf32> to vector<16x64xbf16>
    %cst_88 = arith.constant dense<0.000000e+00> : vector<16x16xf32>
    %204 = tpu.matmul %199, %201, %cst_88 {dimension_numbers = #tpu.dot_dimension_numbers<[1], [1], [0], [0], [0, 0, 1, 0], [], []>} : vector<16x64xbf16>, vector<16x64xbf16>, vector<16x16xf32> -> vector<16x16xf32>
    %cst_89 = arith.constant 1.250000e-01 : f32
    %205 = vector.broadcast %cst_89 : f32 to vector<16x16xf32>
    %206 = arith.mulf %204, %205 : vector<16x16xf32>
    %207 = vector.broadcast %3 : vector<1x16xf32> to vector<16x16xf32>
    %208 = arith.addf %206, %207 : vector<16x16xf32>
    %cst_90 = arith.constant dense<0xFF800000> : vector<16xf32>
    %209 = vector.multi_reduction <maximumf>, %208, %cst_90 [1] : vector<16x16xf32> to vector<16xf32>
    %210 = vector.shape_cast %209 : vector<16xf32> to vector<16x1xf32>
    %211 = vector.broadcast %210 : vector<16x1xf32> to vector<16x16xf32>
    %212 = arith.subf %208, %211 : vector<16x16xf32>
    %213 = math.exp %212 : vector<16x16xf32>
    %cst_91 = arith.constant dense<0.000000e+00> : vector<16xf32>
    %214 = vector.multi_reduction <add>, %213, %cst_91 [1] : vector<16x16xf32> to vector<16xf32>
    %215 = vector.shape_cast %214 : vector<16xf32> to vector<16x1xf32>
    %216 = tpu.reciprocal %215 {approx = true} : vector<16x1xf32> -> vector<16x1xf32>
    %217 = vector.broadcast %216 : vector<16x1xf32> to vector<16x16xf32>
    %218 = arith.mulf %213, %217 : vector<16x16xf32>
    %219 = arith.truncf %218 : vector<16x16xf32> to vector<16x16xbf16>
    %cst_92 = arith.constant dense<0.000000e+00> : vector<16x64xf32>
    %220 = tpu.matmul %219, %203, %cst_92 {dimension_numbers = #tpu.dot_dimension_numbers<[1], [0], [0], [1], [0, 0, 1, 1], [], []>} : vector<16x16xbf16>, vector<16x64xbf16>, vector<16x64xf32> -> vector<16x64xf32>
    %221 = vector.extract_strided_slice %195 {offsets = [0, 64], sizes = [16, 64], strides = [1, 1]} : vector<16x128xf32> to vector<16x64xf32>
    %222 = arith.truncf %221 : vector<16x64xf32> to vector<16x64xbf16>
    %223 = vector.extract_strided_slice %196 {offsets = [0, 64], sizes = [16, 64], strides = [1, 1]} : vector<16x128xf32> to vector<16x64xf32>
    %224 = arith.truncf %223 : vector<16x64xf32> to vector<16x64xbf16>
    %225 = vector.extract_strided_slice %197 {offsets = [0, 64], sizes = [16, 64], strides = [1, 1]} : vector<16x128xf32> to vector<16x64xf32>
    %226 = arith.truncf %225 : vector<16x64xf32> to vector<16x64xbf16>
    %cst_93 = arith.constant dense<0.000000e+00> : vector<16x16xf32>
    %227 = tpu.matmul %222, %224, %cst_93 {dimension_numbers = #tpu.dot_dimension_numbers<[1], [1], [0], [0], [0, 0, 1, 0], [], []>} : vector<16x64xbf16>, vector<16x64xbf16>, vector<16x16xf32> -> vector<16x16xf32>
    %cst_94 = arith.constant 1.250000e-01 : f32
    %228 = vector.broadcast %cst_94 : f32 to vector<16x16xf32>
    %229 = arith.mulf %227, %228 : vector<16x16xf32>
    %230 = vector.broadcast %3 : vector<1x16xf32> to vector<16x16xf32>
    %231 = arith.addf %229, %230 : vector<16x16xf32>
    %cst_95 = arith.constant dense<0xFF800000> : vector<16xf32>
    %232 = vector.multi_reduction <maximumf>, %231, %cst_95 [1] : vector<16x16xf32> to vector<16xf32>
    %233 = vector.shape_cast %232 : vector<16xf32> to vector<16x1xf32>
    %234 = vector.broadcast %233 : vector<16x1xf32> to vector<16x16xf32>
    %235 = arith.subf %231, %234 : vector<16x16xf32>
    %236 = math.exp %235 : vector<16x16xf32>
    %cst_96 = arith.constant dense<0.000000e+00> : vector<16xf32>
    %237 = vector.multi_reduction <add>, %236, %cst_96 [1] : vector<16x16xf32> to vector<16xf32>
    %238 = vector.shape_cast %237 : vector<16xf32> to vector<16x1xf32>
    %239 = tpu.reciprocal %238 {approx = true} : vector<16x1xf32> -> vector<16x1xf32>
    %240 = vector.broadcast %239 : vector<16x1xf32> to vector<16x16xf32>
    %241 = arith.mulf %236, %240 : vector<16x16xf32>
    %242 = arith.truncf %241 : vector<16x16xf32> to vector<16x16xbf16>
    %cst_97 = arith.constant dense<0.000000e+00> : vector<16x64xf32>
    %243 = tpu.matmul %242, %226, %cst_97 {dimension_numbers = #tpu.dot_dimension_numbers<[1], [0], [0], [1], [0, 0, 1, 1], [], []>} : vector<16x16xbf16>, vector<16x64xbf16>, vector<16x64xf32> -> vector<16x64xf32>
    %244 = tpu.concatenate %220, %243 in 1 : vector<16x64xf32>, vector<16x64xf32> -> vector<16x128xf32>
    %245 = arith.truncf %244 : vector<16x128xf32> to vector<16x128xbf16>
    %c1_98 = arith.constant 1 : index
    %c0_99 = arith.constant 0 : index
    %c0_100 = arith.constant 0 : index
    %246 = vector.load %arg10[%c1_98, %c0_99, %c0_100] : memref<2x128x128xbf16, #tpu.memory_space<vmem>>, vector<1x128x128xbf16>
    %247 = vector.shape_cast %246 : vector<1x128x128xbf16> to vector<128x128xbf16>
    %cst_101 = arith.constant dense<0.000000e+00> : vector<16x128xf32>
    %248 = tpu.matmul %245, %247, %cst_101 {dimension_numbers = #tpu.dot_dimension_numbers<[1], [0], [0], [1], [0, 0, 1, 1], [], []>} : vector<16x128xbf16>, vector<128x128xbf16>, vector<16x128xf32> -> vector<16x128xf32>
    %c1_102 = arith.constant 1 : index
    %c0_103 = arith.constant 0 : index
    %c0_104 = arith.constant 0 : index
    %249 = vector.load %arg11[%c1_102, %c0_103, %c0_104] : memref<2x1x128xf32, #tpu.memory_space<vmem>>, vector<1x1x128xf32>
    %250 = vector.shape_cast %249 : vector<1x1x128xf32> to vector<1x128xf32>
    %251 = vector.broadcast %250 : vector<1x128xf32> to vector<16x128xf32>
    %252 = arith.addf %248, %251 : vector<16x128xf32>
    %253 = arith.addf %186, %252 : vector<16x128xf32>
    %c1_105 = arith.constant 1 : index
    %c0_106 = arith.constant 0 : index
    %c0_107 = arith.constant 0 : index
    %254 = vector.load %arg12[%c1_105, %c0_106, %c0_107] : memref<2x1x128xf32, #tpu.memory_space<vmem>>, vector<1x1x128xf32>
    %255 = vector.shape_cast %254 : vector<1x1x128xf32> to vector<1x128xf32>
    %c1_108 = arith.constant 1 : index
    %c0_109 = arith.constant 0 : index
    %c0_110 = arith.constant 0 : index
    %256 = vector.load %arg13[%c1_108, %c0_109, %c0_110] : memref<2x1x128xf32, #tpu.memory_space<vmem>>, vector<1x1x128xf32>
    %257 = vector.shape_cast %256 : vector<1x1x128xf32> to vector<1x128xf32>
    %cst_111 = arith.constant dense<0.000000e+00> : vector<16xf32>
    %258 = vector.multi_reduction <add>, %253, %cst_111 [1] : vector<16x128xf32> to vector<16xf32>
    %259 = vector.shape_cast %258 : vector<16xf32> to vector<16x1xf32>
    %cst_112 = arith.constant 1.280000e+02 : f32
    %260 = vector.broadcast %cst_112 : f32 to vector<16x1xf32>
    %261 = arith.divf %259, %260 : vector<16x1xf32>
    %262 = vector.broadcast %261 : vector<16x1xf32> to vector<16x128xf32>
    %263 = arith.subf %253, %262 : vector<16x128xf32>
    %264 = arith.mulf %263, %263 : vector<16x128xf32>
    %cst_113 = arith.constant dense<0.000000e+00> : vector<16xf32>
    %265 = vector.multi_reduction <add>, %264, %cst_113 [1] : vector<16x128xf32> to vector<16xf32>
    %266 = vector.shape_cast %265 : vector<16xf32> to vector<16x1xf32>
    %cst_114 = arith.constant 1.280000e+02 : f32
    %267 = vector.broadcast %cst_114 : f32 to vector<16x1xf32>
    %268 = arith.divf %266, %267 : vector<16x1xf32>
    %269 = vector.broadcast %261 : vector<16x1xf32> to vector<16x128xf32>
    %270 = arith.subf %253, %269 : vector<16x128xf32>
    %cst_115 = arith.constant 9.99999996E-13 : f32
    %271 = vector.broadcast %cst_115 : f32 to vector<16x1xf32>
    %272 = arith.addf %268, %271 : vector<16x1xf32>
    %273 = math.rsqrt %272 : vector<16x1xf32>
    %274 = vector.broadcast %273 : vector<16x1xf32> to vector<16x128xf32>
    %275 = arith.mulf %270, %274 : vector<16x128xf32>
    %276 = vector.broadcast %255 : vector<1x128xf32> to vector<16x128xf32>
    %277 = arith.mulf %275, %276 : vector<16x128xf32>
    %278 = vector.broadcast %257 : vector<1x128xf32> to vector<16x128xf32>
    %279 = arith.addf %277, %278 : vector<16x128xf32>
    %280 = arith.truncf %279 : vector<16x128xf32> to vector<16x128xbf16>
    %c1_116 = arith.constant 1 : index
    %c0_117 = arith.constant 0 : index
    %c0_118 = arith.constant 0 : index
    %281 = vector.load %arg14[%c1_116, %c0_117, %c0_118] : memref<2x128x256xbf16, #tpu.memory_space<vmem>>, vector<1x128x256xbf16>
    %282 = vector.shape_cast %281 : vector<1x128x256xbf16> to vector<128x256xbf16>
    %cst_119 = arith.constant dense<0.000000e+00> : vector<16x256xf32>
    %283 = tpu.matmul %280, %282, %cst_119 {dimension_numbers = #tpu.dot_dimension_numbers<[1], [0], [0], [1], [0, 0, 1, 1], [], []>} : vector<16x128xbf16>, vector<128x256xbf16>, vector<16x256xf32> -> vector<16x256xf32>
    %c1_120 = arith.constant 1 : index
    %c0_121 = arith.constant 0 : index
    %c0_122 = arith.constant 0 : index
    %284 = vector.load %arg15[%c1_120, %c0_121, %c0_122] : memref<2x1x256xf32, #tpu.memory_space<vmem>>, vector<1x1x256xf32>
    %285 = vector.shape_cast %284 : vector<1x1x256xf32> to vector<1x256xf32>
    %286 = vector.broadcast %285 : vector<1x256xf32> to vector<16x256xf32>
    %287 = arith.addf %283, %286 : vector<16x256xf32>
    %288 = arith.mulf %287, %287 : vector<16x256xf32>
    %289 = arith.mulf %287, %288 : vector<16x256xf32>
    %cst_123 = arith.constant 4.471500e-02 : f32
    %290 = vector.broadcast %cst_123 : f32 to vector<16x256xf32>
    %291 = arith.mulf %290, %289 : vector<16x256xf32>
    %292 = arith.addf %287, %291 : vector<16x256xf32>
    %cst_124 = arith.constant 0.797884583 : f32
    %293 = vector.broadcast %cst_124 : f32 to vector<16x256xf32>
    %294 = arith.mulf %293, %292 : vector<16x256xf32>
    %295 = math.tanh %294 : vector<16x256xf32>
    %cst_125 = arith.constant 1.000000e+00 : f32
    %296 = vector.broadcast %cst_125 : f32 to vector<16x256xf32>
    %297 = arith.addf %296, %295 : vector<16x256xf32>
    %cst_126 = arith.constant 5.000000e-01 : f32
    %298 = vector.broadcast %cst_126 : f32 to vector<16x256xf32>
    %299 = arith.mulf %298, %297 : vector<16x256xf32>
    %300 = arith.mulf %287, %299 : vector<16x256xf32>
    %301 = arith.truncf %300 : vector<16x256xf32> to vector<16x256xbf16>
    %c1_127 = arith.constant 1 : index
    %c0_128 = arith.constant 0 : index
    %c0_129 = arith.constant 0 : index
    %302 = vector.load %arg16[%c1_127, %c0_128, %c0_129] : memref<2x256x128xbf16, #tpu.memory_space<vmem>>, vector<1x256x128xbf16>
    %303 = vector.shape_cast %302 : vector<1x256x128xbf16> to vector<256x128xbf16>
    %cst_130 = arith.constant dense<0.000000e+00> : vector<16x128xf32>
    %304 = tpu.matmul %301, %303, %cst_130 {dimension_numbers = #tpu.dot_dimension_numbers<[1], [0], [0], [1], [0, 0, 1, 1], [], []>} : vector<16x256xbf16>, vector<256x128xbf16>, vector<16x128xf32> -> vector<16x128xf32>
    %c1_131 = arith.constant 1 : index
    %c0_132 = arith.constant 0 : index
    %c0_133 = arith.constant 0 : index
    %305 = vector.load %arg17[%c1_131, %c0_132, %c0_133] : memref<2x1x128xf32, #tpu.memory_space<vmem>>, vector<1x1x128xf32>
    %306 = vector.shape_cast %305 : vector<1x1x128xf32> to vector<1x128xf32>
    %307 = vector.broadcast %306 : vector<1x128xf32> to vector<16x128xf32>
    %308 = arith.addf %304, %307 : vector<16x128xf32>
    %309 = arith.addf %279, %308 : vector<16x128xf32>
    %c1_134 = arith.constant 1 : index
    %c0_135 = arith.constant 0 : index
    %c0_136 = arith.constant 0 : index
    %310 = vector.load %arg18[%c1_134, %c0_135, %c0_136] : memref<2x1x128xf32, #tpu.memory_space<vmem>>, vector<1x1x128xf32>
    %311 = vector.shape_cast %310 : vector<1x1x128xf32> to vector<1x128xf32>
    %c1_137 = arith.constant 1 : index
    %c0_138 = arith.constant 0 : index
    %c0_139 = arith.constant 0 : index
    %312 = vector.load %arg19[%c1_137, %c0_138, %c0_139] : memref<2x1x128xf32, #tpu.memory_space<vmem>>, vector<1x1x128xf32>
    %313 = vector.shape_cast %312 : vector<1x1x128xf32> to vector<1x128xf32>
    %cst_140 = arith.constant dense<0.000000e+00> : vector<16xf32>
    %314 = vector.multi_reduction <add>, %309, %cst_140 [1] : vector<16x128xf32> to vector<16xf32>
    %315 = vector.shape_cast %314 : vector<16xf32> to vector<16x1xf32>
    %cst_141 = arith.constant 1.280000e+02 : f32
    %316 = vector.broadcast %cst_141 : f32 to vector<16x1xf32>
    %317 = arith.divf %315, %316 : vector<16x1xf32>
    %318 = vector.broadcast %317 : vector<16x1xf32> to vector<16x128xf32>
    %319 = arith.subf %309, %318 : vector<16x128xf32>
    %320 = arith.mulf %319, %319 : vector<16x128xf32>
    %cst_142 = arith.constant dense<0.000000e+00> : vector<16xf32>
    %321 = vector.multi_reduction <add>, %320, %cst_142 [1] : vector<16x128xf32> to vector<16xf32>
    %322 = vector.shape_cast %321 : vector<16xf32> to vector<16x1xf32>
    %cst_143 = arith.constant 1.280000e+02 : f32
    %323 = vector.broadcast %cst_143 : f32 to vector<16x1xf32>
    %324 = arith.divf %322, %323 : vector<16x1xf32>
    %325 = vector.broadcast %317 : vector<16x1xf32> to vector<16x128xf32>
    %326 = arith.subf %309, %325 : vector<16x128xf32>
    %cst_144 = arith.constant 9.99999996E-13 : f32
    %327 = vector.broadcast %cst_144 : f32 to vector<16x1xf32>
    %328 = arith.addf %324, %327 : vector<16x1xf32>
    %329 = math.rsqrt %328 : vector<16x1xf32>
    %330 = vector.broadcast %329 : vector<16x1xf32> to vector<16x128xf32>
    %331 = arith.mulf %326, %330 : vector<16x128xf32>
    %332 = vector.broadcast %311 : vector<1x128xf32> to vector<16x128xf32>
    %333 = arith.mulf %331, %332 : vector<16x128xf32>
    %334 = vector.broadcast %313 : vector<1x128xf32> to vector<16x128xf32>
    %335 = arith.addf %333, %334 : vector<16x128xf32>
    %c0_145 = arith.constant 0 : index
    %c0_146 = arith.constant 0 : index
    %c0_147 = arith.constant 0 : index
    %336 = vector.load %arg2[%c0_145, %c0_146, %c0_147] : memref<1x16x1xi32, #tpu.memory_space<vmem>>, vector<1x16x1xi32>
    %337 = vector.shape_cast %336 : vector<1x16x1xi32> to vector<16x1xi32>
    %338 = tpu.iota {dimensions = array<i32: 1>} : vector<16x16xi32>
    %339 = vector.broadcast %337 : vector<16x1xi32> to vector<16x16xi32>
    %340 = arith.cmpi eq, %339, %338 : vector<16x16xi32>
    %341 = arith.extui %340 : vector<16x16xi1> to vector<16x16xi32>
    %342 = arith.sitofp %341 : vector<16x16xi32> to vector<16x16xf32>
    %cst_148 = arith.constant dense<0.000000e+00> : vector<16x128xf32>
    %343 = tpu.matmul %342, %335, %cst_148 {dimension_numbers = #tpu.dot_dimension_numbers<[1], [0], [0], [1], [0, 0, 1, 1], [], []>} : vector<16x16xf32>, vector<16x128xf32>, vector<16x128xf32> -> vector<16x128xf32>
    %c0_149 = arith.constant 0 : index
    %c0_150 = arith.constant 0 : index
    %c0_151 = arith.constant 0 : index
    %344 = vector.load %arg20[%c0_149, %c0_150, %c0_151] : memref<1x16x128xf32, #tpu.memory_space<vmem>>, vector<1x16x128xf32>
    %345 = vector.shape_cast %344 : vector<1x16x128xf32> to vector<16x128xf32>
    %346 = vector.shape_cast %343 : vector<16x128xf32> to vector<1x16x128xf32>
    tpu.vector_store %arg20[%c0_149, %c0_150, %c0_151], %346 {strides = array<i32>} : memref<1x16x128xf32, #tpu.memory_space<vmem>>, vector<1x16x128xf32>,
    return
  }
  func.func @transform_0(%arg0: i32) -> (i32, i32, i32) {
    %c0_i32 = arith.constant 0 : i32
    %c0_i32_0 = arith.constant 0 : i32
    %c0_i32_1 = arith.constant 0 : i32
    return %arg0, %c0_i32, %c0_i32_0 : i32, i32, i32
  }
  func.func @transform_1(%arg0: i32) -> (i32, i32, i32) {
    %c0_i32 = arith.constant 0 : i32
    %c0_i32_0 = arith.constant 0 : i32
    %c0_i32_1 = arith.constant 0 : i32
    return %arg0, %c0_i32, %c0_i32_0 : i32, i32, i32
  }
  func.func @transform_2(%arg0: i32) -> (i32, i32, i32) {
    %c0_i32 = arith.constant 0 : i32
    %c0_i32_0 = arith.constant 0 : i32
    %c0_i32_1 = arith.constant 0 : i32
    return %arg0, %c0_i32, %c0_i32_0 : i32, i32, i32
  }
  func.func @transform_3(%arg0: i32) -> (i32, i32) {
    %c0_i32 = arith.constant 0 : i32
    %c0_i32_0 = arith.constant 0 : i32
    %c0_i32_1 = arith.constant 0 : i32
    return %c0_i32, %c0_i32_0 : i32, i32
  }
  func.func @transform_4(%arg0: i32) -> (i32, i32) {
    %c0_i32 = arith.constant 0 : i32
    %c0_i32_0 = arith.constant 0 : i32
    %c0_i32_1 = arith.constant 0 : i32
    return %c0_i32, %c0_i32_0 : i32, i32
  }
  func.func @transform_5(%arg0: i32) -> (i32, i32) {
    %c0_i32 = arith.constant 0 : i32
    %c0_i32_0 = arith.constant 0 : i32
    %c0_i32_1 = arith.constant 0 : i32
    return %c0_i32, %c0_i32_0 : i32, i32
  }
  func.func @transform_6(%arg0: i32) -> (i32, i32) {
    %c0_i32 = arith.constant 0 : i32
    %c0_i32_0 = arith.constant 0 : i32
    %c0_i32_1 = arith.constant 0 : i32
    return %c0_i32, %c0_i32_0 : i32, i32
  }
  func.func @transform_7(%arg0: i32) -> (i32, i32, i32) {
    %c0_i32 = arith.constant 0 : i32
    %c0_i32_0 = arith.constant 0 : i32
    %c0_i32_1 = arith.constant 0 : i32
    %c0_i32_2 = arith.constant 0 : i32
    return %c0_i32, %c0_i32_0, %c0_i32_1 : i32, i32, i32
  }
  func.func @transform_8(%arg0: i32) -> (i32, i32, i32) {
    %c0_i32 = arith.constant 0 : i32
    %c0_i32_0 = arith.constant 0 : i32
    %c0_i32_1 = arith.constant 0 : i32
    %c0_i32_2 = arith.constant 0 : i32
    return %c0_i32, %c0_i32_0, %c0_i32_1 : i32, i32, i32
  }
  func.func @transform_9(%arg0: i32) -> (i32, i32, i32) {
    %c0_i32 = arith.constant 0 : i32
    %c0_i32_0 = arith.constant 0 : i32
    %c0_i32_1 = arith.constant 0 : i32
    %c0_i32_2 = arith.constant 0 : i32
    return %c0_i32, %c0_i32_0, %c0_i32_1 : i32, i32, i32
  }
  func.func @transform_10(%arg0: i32) -> (i32, i32, i32) {
    %c0_i32 = arith.constant 0 : i32
    %c0_i32_0 = arith.constant 0 : i32
    %c0_i32_1 = arith.constant 0 : i32
    %c0_i32_2 = arith.constant 0 : i32
    return %c0_i32, %c0_i32_0, %c0_i32_1 : i32, i32, i32
  }
  func.func @transform_11(%arg0: i32) -> (i32, i32, i32) {
    %c0_i32 = arith.constant 0 : i32
    %c0_i32_0 = arith.constant 0 : i32
    %c0_i32_1 = arith.constant 0 : i32
    %c0_i32_2 = arith.constant 0 : i32
    return %c0_i32, %c0_i32_0, %c0_i32_1 : i32, i32, i32
  }
  func.func @transform_12(%arg0: i32) -> (i32, i32, i32) {
    %c0_i32 = arith.constant 0 : i32
    %c0_i32_0 = arith.constant 0 : i32
    %c0_i32_1 = arith.constant 0 : i32
    %c0_i32_2 = arith.constant 0 : i32
    return %c0_i32, %c0_i32_0, %c0_i32_1 : i32, i32, i32
  }
  func.func @transform_13(%arg0: i32) -> (i32, i32, i32) {
    %c0_i32 = arith.constant 0 : i32
    %c0_i32_0 = arith.constant 0 : i32
    %c0_i32_1 = arith.constant 0 : i32
    %c0_i32_2 = arith.constant 0 : i32
    return %c0_i32, %c0_i32_0, %c0_i32_1 : i32, i32, i32
  }
  func.func @transform_14(%arg0: i32) -> (i32, i32, i32) {
    %c0_i32 = arith.constant 0 : i32
    %c0_i32_0 = arith.constant 0 : i32
    %c0_i32_1 = arith.constant 0 : i32
    %c0_i32_2 = arith.constant 0 : i32
    return %c0_i32, %c0_i32_0, %c0_i32_1 : i32, i32, i32
  }
  func.func @transform_15(%arg0: i32) -> (i32, i32, i32) {
    %c0_i32 = arith.constant 0 : i32
    %c0_i32_0 = arith.constant 0 : i32
    %c0_i32_1 = arith.constant 0 : i32
    %c0_i32_2 = arith.constant 0 : i32
    return %c0_i32, %c0_i32_0, %c0_i32_1 : i32, i32, i32
  }
  func.func @transform_16(%arg0: i32) -> (i32, i32, i32) {
    %c0_i32 = arith.constant 0 : i32
    %c0_i32_0 = arith.constant 0 : i32
    %c0_i32_1 = arith.constant 0 : i32
    %c0_i32_2 = arith.constant 0 : i32
    return %c0_i32, %c0_i32_0, %c0_i32_1 : i32, i32, i32
  }
  func.func @transform_17(%arg0: i32) -> (i32, i32, i32) {
    %c0_i32 = arith.constant 0 : i32
    %c0_i32_0 = arith.constant 0 : i32
    %c0_i32_1 = arith.constant 0 : i32
    %c0_i32_2 = arith.constant 0 : i32
    return %c0_i32, %c0_i32_0, %c0_i32_1 : i32, i32, i32
  }
  func.func @transform_18(%arg0: i32) -> (i32, i32, i32) {
    %c0_i32 = arith.constant 0 : i32
    %c0_i32_0 = arith.constant 0 : i32
    %c0_i32_1 = arith.constant 0 : i32
    %c0_i32_2 = arith.constant 0 : i32
    return %c0_i32, %c0_i32_0, %c0_i32_1 : i32, i32, i32
  }
  func.func @transform_19(%arg0: i32) -> (i32, i32, i32) {
    %c0_i32 = arith.constant 0 : i32
    %c0_i32_0 = arith.constant 0 : i32
    %c0_i32_1 = arith.constant 0 : i32
    return %arg0, %c0_i32, %c0_i32_0 : i32, i32, i32
  }
}

</mosaic_0001>

<bundles_post_ra>
// kernel: tpu_custom_call.1
= control target key start
LH: loop header
LB: loop body
LE: loop exit
PB: predicated region body
PF: predicated region fallthrough
CT: control target
= control target key end

     0   :  { %s4920_s0 = inlined_call_operand.vmem [shape: s32[2,16,1], index: 0, kind: input, shape index: {}]   ;;  %s4921_s1 = inlined_call_operand.vmem [shape: s32[2,16,1], index: 1, kind: input, shape index: {}]   ;;  %s4922_s2 = inlined_call_operand.hbm [shape: f32[2,1,16], index: 2, kind: input, shape index: {}]   ;;  %s4923_s3 = inlined_call_operand.hbm [shape: f32[16,128], index: 3, kind: input, shape index: {}]   ;;  %s4924_s4 = inlined_call_operand.vmem [shape: bf16[128,128], index: 4, kind: input, shape index: {}]   ;;  %s4925_s5 = inlined_call_operand.hbm [shape: f32[1,128], index: 5, kind: input, shape index: {}]   ;;  %s4926_s6 = inlined_call_operand.hbm [shape: f32[1,128], index: 6, kind: input, shape index: {}]   ;;  %s4927_s7 = inlined_call_operand.hbm [shape: bf16[2,128,384], index: 7, kind: input, shape index: {}]   ;;  %s4928_s8 = inlined_call_operand.vmem [shape: f32[2,1,384], index: 8, kind: input, shape index: {}]   ;;  %s4929_s9 = inlined_call_operand.hbm [shape: bf16[2,128,128], index: 9, kind: input, shape index: {}]   ;;  %s4930_s10 = inlined_call_operand.hbm [shape: f32[2,1,128], index: 10, kind: input, shape index: {}]   ;;  %s4931_s11 = inlined_call_operand.vmem [shape: f32[2,1,128], index: 11, kind: input, shape index: {}]   ;;  %s4932_s12 = inlined_call_operand.hbm [shape: f32[2,1,128], index: 12, kind: input, shape index: {}]   ;;  %s4933_s13 = inlined_call_operand.hbm [shape: bf16[2,128,256], index: 13, kind: input, shape index: {}]   ;;  %s4934_s14 = inlined_call_operand.vmem [shape: f32[2,1,256], index: 14, kind: input, shape index: {}]   ;;  %s4935_s15 = inlined_call_operand.hbm [shape: bf16[2,256,128], index: 15, kind: input, shape index: {}]   ;;  %s4936_s16 = inlined_call_operand.vmem [shape: f32[2,1,128], index: 16, kind: input, shape index: {}]   ;;  %s4937_s17 = inlined_call_operand.vmem [shape: f32[2,1,128], index: 17, kind: input, shape index: {}]   ;;  %s4938_s18 = inlined_call_operand.vmem [shape: f32[2,1,128], index: 18, kind: input, shape index: {}]   ;;  %s4939_s19 = inlined_call_operand.hbm [shape: f32[2,16,128], index: 19, kind: output, shape index: {}]  }
   0x1   :  { %4950 = sst [smem:[#allocation27_spill]] %s4920_s0 }
   0x2   :  { %4951 = sst [smem:[#allocation28_spill]] %s4921_s1 }
   0x3   :  { %4952 = sst [smem:[#allocation29_spill]] %s4922_s2 }
   0x4   :  { %4953 = sst [smem:[#allocation30_spill]] %s4923_s3 }
   0x5   :  { %4954 = sst [smem:[#allocation31_spill]] %s4924_s4 }
   0x6   :  { %4955 = sst [smem:[#allocation32_spill]] %s4925_s5 }
   0x7   :  { %4956 = sst [smem:[#allocation33_spill]] %s4926_s6 }
   0x8   :  { %4957 = sst [smem:[#allocation34_spill]] %s4927_s7 }
   0x9   :  { %4958 = sst [smem:[#allocation35_spill]] %s4928_s8 }
   0xa   :  { %4959 = sst [smem:[#allocation36_spill]] %s4929_s9 }
   0xb   :  { %4960 = sst [smem:[#allocation37_spill]] %s4930_s10 }
   0xc   :  { %4961 = sst [smem:[#allocation38_spill]] %s4936_s16 }
   0xd   :  { %4962 = sst [smem:[#allocation39_spill]] %s4937_s17 }
   0xe   :  { %4963 = sst [smem:[#allocation40_spill]] %s4938_s18 }
   0xf   :  { %4964 = sst [smem:[#allocation41_spill]] %s4939_s19 }
  0x10   :  { %24 = vsyncpa [#allocation3], 0 }
  0x11   :  { %26 = vsyncpa [#allocation3 + $0x1], 0 }
  0x12   :  { %27 = vsyncpa [#allocation6], 0 }
  0x13   :  { %28 = vsyncpa [#allocation9], 0 }
  0x14   :  { %29 = vsyncpa [#allocation12], 0 }
  0x15   :  { %30 = vsyncpa [#allocation15], 0 }
  0x16   :  { %31 = vsyncpa [#allocation18], 0 }
  0x17   :  { %32 = vsyncpa [#allocation4], 0 }
  0x18   :  { %34 = vsyncpa [#allocation4 + $0x1], 0  ;;  %s4479_s0 = smov 0   ;;  %s4481_s30 = smov 0  }
  0x19   :  { %s4483_s20 = smov 0   ;;  %s4485_s21 = smov 0  }
  0x1a LB: > { %s4965_s2 = sld [smem:[#allocation30_spill]]  ;;  %s4503_s24 = sadd.s32 4294967295, %s4353_s21   ;;  %s4353_s21 = sphi %s4485_s21, %s4994_s21   ;;  %s4349_s20 = sphi %s4483_s20, %s4993_s20   ;;  %s4345_s30 = sphi %s4481_s30, %s4992_s30   ;;  %s4341_s0 = sphi %s4479_s0, %s4991_s0  }
  0x1b   : > { %p2981_p0 = scmp.ge.s32.totalorder %s4353_s21, 1  ;;  %p113_p1 = scmp.eq.s32.totalorder %s4503_s24, 0 }
  0x1c   : > { %p485_p2 = scmp.lt.s32.totalorder %s4353_s21, 3  ;;  %s4355_s3 = smov [#allocation5]  }
  0x1d   : > { %s498_s26 = sshll.u32 %s4355_s3, 4  ;;  %s4967_s6 = sld [smem:[#allocation33_spill]]  ;;  %s499_s26 = int_to_ptr.vmem [resolvable:$true] %s498_s26 }
  0x1e   : > { %p4508_p3 = pnand %p2981_p0, %p485_p2  ;;  %s4969_s9 = sld [smem:[#allocation36_spill]] }
  0x1f   : > { %s4356_s19 = smov [#allocation8]   ;;  %s4945_s17 = smov 128  }
  0x20   : > { %s496_s23 = sshll.u32 %s4965_s2, 4  ;;  %p3757_p4 = pneg %p4508_p3  ;;  %s497_s23 = int_to_ptr.hbm [resolvable:$true] %s496_s23 }
  0x21   : > { %s528_s18 = sshll.u32 %s4356_s19, 4  ;;  %s4946_s16 = smov 8   ;;  %s529_s18 = int_to_ptr.vmem [resolvable:$true] %s528_s18 }
  0x22   : > { %p4520_p6 = pnand %p3757_p4, %p113_p1  ;;  %s4359_s27 = smov [#allocation11]  }
  0x23   : > { %s526_s29 = sshll.u32 %s4967_s6, 4  ;;  %s556_s28 = sshll.u32 %s4359_s27, 4  ;;  %s527_s29 = int_to_ptr.hbm [resolvable:$true] %s526_s29  ;;  %s557_s28 = int_to_ptr.vmem [resolvable:$true] %s556_s28 }
  0x24   : > { %s554_s3 = sshll.u32 %s4969_s9, 4  ;;  %s4947_s6 = smov 64   ;;  %s555_s3 = int_to_ptr.hbm [resolvable:$true] %s554_s3 }
  0x25   : > { %3760 = dma.hbm_to_vmem [thread:$0]  (!%p4520_p6), %s497_s23, 256, %s499_s26, [#allocation6], %s4945_s17, %s4945_s17, %s4946_s16  }
  0x26   : > { %3766 = dma.hbm_to_vmem [thread:$0]  (!%p4520_p6), %s527_s29, 16, %s529_s18, [#allocation9]  }
  0x27   : > { %s4948_s22 = smov 4   ;;  %s585_s23 = sshll.u32 %s4932_s12, 4  ;;  %s586_s23 = int_to_ptr.hbm [resolvable:$true] %s585_s23 }
  0x28   : > { %3772 = dma.hbm_to_vmem [thread:$0]  (!%p4520_p6), %s555_s3, 2048, %s557_s28, [#allocation12], %s4947_s6, %s4947_s6, %s4948_s22  }
  0x29   : > { %s4362_s26 = smov [#allocation14]   ;;  %s4970_s5 = sld [smem:[#allocation32_spill]] }
  0x2a   : > { %s587_s17 = sshll.u32 %s4362_s26, 4  ;;  %s4363_s16 = smov 16   ;;  %s588_s17 = int_to_ptr.vmem [resolvable:$true] %s587_s17 }
  0x2b   : > { %s4364_s9 = smov 1   ;;  %s4971_s7 = sld [smem:[#allocation34_spill]] }
  0x2c   : > { %3778 = dma.hbm_to_vmem [thread:$0]  (!%p4520_p6), %s586_s23, 32, %s588_s17, [#allocation15], %s4363_s16, %s4363_s16, %s4364_s9  }
  0x2d   : > { %s4365_s2 = smov [#allocation7]   ;;  %s4366_s26 = smov [#allocation10]  }
  0x2e   : > { %s516_s6 = sshll.u32 %s4365_s2, 4  ;;  %s539_s18 = sshll.u32 %s4366_s26, 4  ;;  %s517_s6 = int_to_ptr.vmem [resolvable:$true] %s516_s6  ;;  %s540_s18 = int_to_ptr.vmem [resolvable:$true] %s539_s18 }
  0x2f   : > { %s514_s27 = sshll.u32 %s4970_s5, 4  ;;  %s4367_s29 = smov 192   ;;  %s515_s27 = int_to_ptr.hbm [resolvable:$true] %s514_s27 }
  0x30   : > { %3763 = dma.hbm_to_vmem [thread:$0]  (!%p4520_p6), %s515_s27, 16, %s517_s6, [#allocation6]  }
  0x31   : > { %s537_s19 = sshll.u32 %s4971_s7, 4  ;;  %s4368_s22 = smov 12   ;;  %s538_s19 = int_to_ptr.hbm [resolvable:$true] %s537_s19 }
  0x32   : > { %3769 = dma.hbm_to_vmem [thread:$0]  (!%p4520_p6), %s538_s19, 6144, %s540_s18, [#allocation9], %s4367_s29, %s4367_s29, %s4368_s22  }
  0x33   : > { %s4972_s10 = sld [smem:[#allocation37_spill]]  ;;  %s4369_s28 = smov [#allocation13]  }
  0x34   : > { %s570_s2 = sshll.u32 %s4369_s28, 4  ;;  %s599_s26 = sshll.u32 %s4933_s13, 4  ;;  %s571_s2 = int_to_ptr.vmem [resolvable:$true] %s570_s2  ;;  %s600_s26 = int_to_ptr.hbm [resolvable:$true] %s599_s26 }
  0x35   : > { %s4370_s22 = smov [#allocation16]   ;;  %s616_s17 = sshll.u32 %s4935_s15, 4  ;;  %s617_s17 = int_to_ptr.hbm [resolvable:$true] %s616_s17 }
  0x36   : > { %s601_s19 = sshll.u32 %s4370_s22, 4  ;;  %s4973_s23 = smov 8   ;;  %s602_s19 = int_to_ptr.vmem [resolvable:$true] %s601_s19 }
  0x37   : > { %s4974_s28 = smov 128   ;;  %s2980_s6 = sadd.s32 4294967294, %s4353_s21  }
  0x38   : > { %3781 = dma.hbm_to_vmem [thread:$0]  (!%p4520_p6), %s600_s26, 4096, %s602_s19, [#allocation15], %s4974_s28, %s4974_s28, %s4973_s23  }
  0x39   : > { %s568_s3 = sshll.u32 %s4972_s10, 4  ;;  %s4577_s27 = sadd.s32 1, %s4353_s21   ;;  %s569_s3 = int_to_ptr.hbm [resolvable:$true] %s568_s3 }
  0x3a   : > { %3775 = dma.hbm_to_vmem [thread:$0]  (!%p4520_p6), %s569_s3, 32, %s571_s2, [#allocation12], %s4363_s16, %s4363_s16, %s4364_s9  }
  0x3b   : > { %s4371_s9 = smov [#allocation17]   ;;  %s4975_s3 = smov 4  }
  0x3c   : > { %s618_s16 = sshll.u32 %s4371_s9, 4  ;;  %s4976_s2 = smov 64   ;;  %s619_s16 = int_to_ptr.vmem [resolvable:$true] %s618_s16 }
  0x3d   : > { %3784 = dma.hbm_to_vmem [thread:$0]  (!%p4520_p6), %s617_s17, 4096, %s619_s16, [#allocation18], %s4976_s2, %s4976_s2, %s4975_s3  }
  0x3e   : > { %s99_s22 = sadd.s32 1, %s4349_s20  ;;  %s96_s18 = ssub.s32 %s4353_s21, %s4577_s27 }
  0x3f   : > { %p106_p7 = scmp.ne.s32.totalorder %s4349_s20, %s4345_s30  ;;  %p97_p8 = scmp.eq.s32.totalorder %s96_s18, 0 }
  0x40   : > { %p107_p9 = scmp.eq.s32.totalorder %s4353_s21, 0  ;;  %p112_p10 = scmp.ne.s32.totalorder %s4345_s30, %s4341_s0 }
  0x41   : > { %p472_p11 = scmp.eq.s32.totalorder %s4503_s24, 1  ;;  %p478_p0 = scmp.eq.s32.totalorder %s2980_s6, 1 }
  0x42   : > { %s4589_s26 = scalar_select %p97_p8, %s4349_s20, %s99_s22  }
  0x43   : > { %p4593_p12 = por %p113_p1, %p112_p10  ;;  %p4597_p13 = por %p472_p11, %p106_p7 }
  0x44   : > { %p108_p2 = por %p107_p9, %p106_p7  ;;  %s657_s29 = sand.u32 1, %s4349_s20  }
  0x45   : > { %p4602_p4 = por %p478_p0, %p112_p10  ;;  %p3802_p6 = scmp.lt.s32.totalorder %s4353_s21, 2 }
  0x46   : > { %s4980_s9 = sld [smem:[#allocation29_spill]]  ;;  %s660_s2 = scalar_lea.vmem [#allocation2], %s657_s29 }
  0x47   : > { %s667_s22 = sshll.u32 %s660_s2, 4  ;;  %p4611_p8 = pnand %p3802_p6, %p108_p2  ;;  %s668_s22 = int_to_ptr.vmem [resolvable:$true] %s667_s22 }
  0x48   : > { %s658_s6 = scalar_lea.sflag [#allocation3], %s657_s29 }
  0x49   : > { %p4241_p9 = pneg %p4611_p8 }
  0x4c   : > { %s663_s16 = scalar_lea.hbm %s4980_s9, %s4353_s21 }
  0x4d   : > { %s665_s3 = sshll.u32 %s663_s16, 4  ;;  %s4244_s16 = scalar_lea.hbm %s4980_s9, 2  ;;  %s666_s3 = int_to_ptr.hbm [resolvable:$true] %s665_s3 }
  0x4e   : > { %s4237_s5 = sshra.s32 %s666_s3, 4  ;;  %s4238_s5 = int_to_ptr.hbm [resolvable:$true] %s4237_s5 }
  0x4f   : > { %s4239_s7 = scalar_lea.hbm %s4238_s5, 1  ;;  %p4245_p0 = scmp.lt.s32.totalorder %s4238_s5, %s4980_s9 }
  0x50   : > { %p4240_p7 = scmp.ne.s32.totalorder %s4238_s5, %s4239_s7  ;;  %p4246_p2 = scmp.lt.s32.totalorder %s4244_s16, %s4239_s7 }
  0x52   : > { %p4242_p10 = pnand %p4241_p9, %p4240_p7  ;;  %p4247_p6 = por %p4246_p2, %p4245_p0 }
  0x54   : > { %p4243_p11 = pneg %p4242_p10 }
  0x56   : > { %p4248_p5 = pnand %p4247_p6, %p4243_p11 }
  0x58   : > { %4251 = shalt.err (!%p4248_p5)
}
  0x59   : > { %3788 = dma.hbm_to_vmem [thread:$0]  (!%p4611_p8), %s666_s3, 16, %s668_s22, %s658_s6  }
  0x5a   : > { %676 = sbr.rel (%p4508_p3) target bundleno = 4590 (0x11ee), region = 96  ;;  %s4628_s29 = sand.u32 (!%p4508_p3), 1, %s4345_s30  }
  0x5b   : > { %s679_s23 = scalar_lea.sflag (!%p4508_p3), [#allocation3], %s4628_s29  ;;  %s681_s28 = scalar_lea.vmem (!%p4508_p3), [#allocation2], %s4628_s29 }
  0x5f   : > { %4312 = dma.done.wait (%p4593_p12), %s679_s23, 16  }
  0x60   : > { %4314 = vsyncadd (%p4593_p12), %s679_s23, 4294967280 }
  0x61   : > { %4316 = dma.done.wait (%p113_p1), [#allocation6], 272  }
  0x62   : > { %4318 = vsyncadd (%p113_p1), [#allocation6], 4294967024 }
  0x63   : > { %4320 = dma.done.wait (%p113_p1), [#allocation9], 6160  }
  0x64   : > { %4322 = vsyncadd (%p113_p1), [#allocation9], 4294961136 }
  0x65   : > { %4324 = dma.done.wait (%p113_p1), [#allocation12], 2080  }
  0x66   : > { %4326 = vsyncadd (%p113_p1), [#allocation12], 4294965216 }
  0x67   : > { %4328 = dma.done.wait (%p113_p1), [#allocation15], 4128  }
  0x68   : > { %4330 = vsyncadd (%p113_p1), [#allocation15], 4294963168 }
  0x69   : > { %4332 = dma.done.wait (%p113_p1), [#allocation18], 4096  }
  0x6a   : > { %4334 = vsyncadd (%p113_p1), [#allocation18], 4294963200  ;;  %p791_p3 = scmp.lt.s32.totalorder %s4503_s24, 1  ;;  %v4372_v0 = vmov 0   ;;  %s4982_s1 = sld [smem:[#allocation27_spill]]  ;;  %v805_v12 = vlaneseq  ;;  %v836_v16 = vld [vmem:[#allocation5] sm:$0xff] }
  0x6b   : > { %3869 = vset.pattern.permute.xlu0 %v4372_v0  ;;  %3880 = vset.pattern.permute.xlu1 %v4372_v0  ;;  %s4983_s4 = sld [smem:[#allocation31_spill]]  ;;  %v4373_v15 = vmov 1.0|1.0   ;;  %v837_v19 = vld [vmem:[#allocation5 + $0x8] sm:$0xff]  ;;  %v4374_v22 = vmov 128.0   ;;  %vm1173_vm10 = vcmask 523264  }
  0x6c   : > { %s4658_s5 = scalar_select %p791_p3, %s4503_s24, 1  ;;  %v4690_v13 = vand.u32 127, %v805_v12  ;;  %3896 = vrcp.f32 %v4374_v22  ;;  %v3129_v37 = vld [vmem:[#allocation10 + $0xa8] sm:$0xf]  ;;  %v3610_v38 = vld [vmem:[#allocation10 + $0xb0] sm:$0xf0] }
  0x6d   : > { %v3609_v39 = vld [vmem:[#allocation10 + $0xac] sm:$0xf]  ;;  %v3130_v40 = vor.u32 %v3610_v38, %v3129_v37  ;;  %v3131_v41 = vld [vmem:[#allocation10 + $0xb4] sm:$0xf0]  ;;  %v3137_v42 = vld [vmem:[#allocation10 + $0xb0] sm:$0xf] }
  0x6e   : > { %s3578_s7 = sshll.u32 %s4658_s5, 4  ;;  %v3611_v43 = vld [vmem:[#allocation10 + $0xb8] sm:$0xf0]  ;;  %v3134_v44 = vor.u32 %v3609_v39, %v3131_v41  ;;  %v3117_v46 = vld [vmem:[#allocation10 + $0x90] sm:$0xf]  ;;  %s4984_s8 = sld [smem:[#allocation35_spill]] }
  0x6f   : > { %v3138_v45 = vor.u32 %v3611_v43, %v3137_v42  ;;  %1128 = vmatpush.bf16.msra.mxu1 %v3130_v40  ;;  %v3607_v47 = vld [vmem:[#allocation10 + $0x98] sm:$0xf0]  ;;  %v3606_v48 = vld [vmem:[#allocation10 + $0x94] sm:$0xf]  ;;  %v3119_v50 = vld [vmem:[#allocation10 + $0x9c] sm:$0xf0] }
  0x70   : > { %s795_s3 = scalar_lea.vmem %s4982_s1, %s3578_s7  ;;  %1142 = vmatpush.bf16.msra.mxu2 %v3134_v44  ;;  %v3118_v49 = vor.u32 %v3607_v47, %v3117_v46  ;;  %v3125_v51 = vld [vmem:[#allocation10 + $0x98] sm:$0xf]  ;;  %v3608_v52 = vld [vmem:[#allocation10 + $0xa0] sm:$0xf0]  ;;  %v3122_v53 = vor.u32 %v3606_v48, %v3119_v50  ;;  %v3603_v57 = vld [vmem:[#allocation10 + $0x7c] sm:$0xf] }
  0x71   : > { %v802_v1 = vld [vmem:[%s795_s3] sm:$0xff]  ;;  %v3587_v2 = vld [vmem:[%s4983_s4 + $0x38] sm:$0xff]  ;;  %v3586_v3 = vld [vmem:[%s4983_s4 + $0x30] sm:$0xff]  ;;  %1156 = vmatpush.bf16.msra.mxu3 %v3138_v45  ;;  %v3126_v54 = vor.u32 %v3608_v52, %v3125_v51  ;;  %s4375_s1 = smov 64   ;;  %vm1201_vm11 = vcmask 130048   ;;  %s4985_s23 = sld [smem:[#allocation38_spill]] }
  0x72   : > { %808 = vperm.xlu0 %3869, %v802_v1   ;;  %886 = vmatpush.bf16.msra.mxu0 %v3587_v2  ;;  %v803_v4 = vld [vmem:[%s795_s3 + $0x8] sm:$0xff]  ;;  %v3584_v6 = vld [vmem:[%s4983_s4 + $0x20] sm:$0xff]  ;;  %v3583_v7 = vld [vmem:[%s4983_s4 + $0x18] sm:$0xff]  ;;  %v3897_v23 = vpop.eup %3896  ;;  %s4986_s22 = sld [smem:[#allocation39_spill]]  ;;  %s3002_s18 = sshll.u32 %s4628_s29, 4 }
  0x73   : > { %v3585_v5 = vld [vmem:[%s4983_s4 + $0x28] sm:$0xff]  ;;  %v3582_v8 = vld [vmem:[%s4983_s4 + $0x10] sm:$0xff]  ;;  %v3580_v10 = vld [vmem:[%s4983_s4] sm:$0xff]  ;;  %v907_v24 = vmul.f32 128.0, %v3897_v23  ;;  %vm911_vm3 = vweird.f32 %v3897_v23  ;;  %1129 = vmatpush.bf16.msra.mxu1 %v3118_v49  ;;  %s4987_s3 = sld [smem:[#allocation40_spill]]  ;;  %s3716_s6 = sshll.u32 %s4503_s24, 4 }
  0x74   : > { %v3581_v9 = vld [vmem:[%s4983_s4 + $0x8] sm:$0xff]  ;;  %1143 = vmatpush.bf16.msra.mxu2 %v3122_v53  ;;  %v3604_v56 = vld [vmem:[#allocation10 + $0x80] sm:$0xf0]  ;;  %v3107_v59 = vld [vmem:[#allocation10 + $0x84] sm:$0xf0]  ;;  %s790_s5 = scalar_lea.vmem [#allocation19], %s3002_s18 }
  0x75   : > { %v908_v25 = vsub.f32 1.0, %v907_v24  ;;  %1157 = vmatpush.bf16.msra.mxu3 %v3126_v54  ;;  %v3105_v55 = vld [vmem:[#allocation10 + $0x78] sm:$0xf]  ;;  %v3113_v60 = vld [vmem:[#allocation10 + $0x80] sm:$0xf]  ;;  %v3110_v62 = vor.u32 %v3603_v57, %v3107_v59  ;;  %s2786_s25 = scalar_lea.sflag [#allocation4], %s4628_s29 }
  0x76   : > { %887 = vmatpush.bf16.msra.mxu0 %v3586_v3  ;;  %v3106_v58 = vor.u32 %v3604_v56, %v3105_v55  ;;  %v3605_v61 = vld [vmem:[#allocation10 + $0x88] sm:$0xf0]  ;;  %v3093_v0 = vld [vmem:[#allocation10 + $0x60] sm:$0xf]  ;;  %v3600_v2 = vld [vmem:[#allocation10 + $0x64] sm:$0xf] }
  0x77   : > { %v909_v26 = vmul.f32 %v3897_v23, %v908_v25  ;;  %v3114_v63 = vor.u32 %v3605_v61, %v3113_v60  ;;  %v3601_v1 = vld [vmem:[#allocation10 + $0x68] sm:$0xf0]  ;;  %v3077_v24 = vld [vmem:[#allocation10 + $0x38] sm:$0xf]  ;;  %v3596_v25 = vld [vmem:[#allocation10 + $0x40] sm:$0xf0] }
  0x78   : > { %1130 = vmatpush.bf16.msra.mxu1 %v3106_v58  ;;  %1144 = vmatpush.bf16.msra.mxu2 %v3110_v62  ;;  %v3094_v3 = vor.u32 %v3601_v1, %v3093_v0  ;;  %v3593_v37 = vld [vmem:[#allocation10 + $0x28] sm:$0xf0]  ;;  %v3045_v40 = vld [vmem:[#allocation10] sm:$0xf]  ;;  %v3588_v42 = vld [vmem:[#allocation10 + $0x4] sm:$0xf] }
  0x79   : > { %v910_v27 = vadd.f32 %v3897_v23, %v909_v26  ;;  %1158 = vmatpush.bf16.msra.mxu3 %v3114_v63  ;;  %v3589_v41 = vld [vmem:[#allocation10 + $0x8] sm:$0xf0]  ;;  %v3047_v45 = vld [vmem:[#allocation10 + $0xc] sm:$0xf0]  ;;  %v3053_v46 = vld [vmem:[#allocation10 + $0x8] sm:$0xf] }
  0x7a   : > { %811 = vperm.xlu0 %3869, %v803_v4   ;;  %888 = vmatpush.bf16.msra.mxu0 %v3585_v5  ;;  %v3095_v4 = vld [vmem:[#allocation10 + $0x6c] sm:$0xf0]  ;;  %v3101_v5 = vld [vmem:[#allocation10 + $0x68] sm:$0xf]  ;;  %v3046_v44 = vor.u32 %v3589_v41, %v3045_v40  ;;  %v3590_v47 = vld [vmem:[#allocation10 + $0x10] sm:$0xf0]  ;;  %v3050_v49 = vor.u32 %v3588_v42, %v3047_v45 }
  0x7b   : > { %v4694_v28 = vsel %vm911_vm3, %v3897_v23, %v910_v27  ;;  %v3071_v23 = vld [vmem:[#allocation10 + $0x3c] sm:$0xf0]  ;;  %v3078_v27 = vor.u32 %v3596_v25, %v3077_v24  ;;  %v3054_v50 = vor.u32 %v3590_v47, %v3053_v46 }
  0x7c   : > { %1131 = vmatpush.bf16.msra.mxu1 %v3094_v3 }
  0x7e   : > { %889 = vmatpush.bf16.msra.mxu0 %v3584_v6  ;;  %v3602_v6 = vld [vmem:[#allocation10 + $0x70] sm:$0xf0] }
  0x82   : > { %890 = vmatpush.bf16.msra.mxu0 %v3583_v7  ;;  %v3098_v7 = vor.u32 %v3600_v2, %v3095_v4  ;;  %v3881_v4 = vld [vmem:[#allocation7] ss:$0 sm:$0xff] }
  0x84   : > { %1145 = vmatpush.bf16.msra.mxu2 %v3098_v7 }
  0x86   : > { %891 = vmatpush.bf16.msra.mxu0 %v3582_v8  ;;  %v3102_v8 = vor.u32 %v3602_v6, %v3101_v5 }
  0x88   : > { %1159 = vmatpush.bf16.msra.mxu3 %v3102_v8 }
  0x8a   : > { %892 = vmatpush.bf16.msra.mxu0 %v3581_v9  ;;  %v3081_v9 = vld [vmem:[#allocation10 + $0x48] sm:$0xf] }
  0x8e   : > { %893 = vmatpush.bf16.msra.mxu0 %v3580_v10  ;;  %v3598_v10 = vld [vmem:[#allocation10 + $0x50] sm:$0xf0] }
  0x8f   : > { %v3082_v12 = vor.u32 %v3598_v10, %v3081_v9  ;;  %v3882_v9 = vld [vmem:[#allocation8] ss:$0 sm:$0xff] }
  0x91   : > { %1132 = vmatpush.bf16.msra.mxu1 %v3082_v12 }
  0xe4   : > { %v809_v11 = vpop.permute.xlu0 %808 }
  0xe5   : > { %vm813_vm0 = vcmp.eq.s32.totalorder %v809_v11, %v4690_v13  ;;  %v3597_v11 = vld [vmem:[#allocation10 + $0x4c] sm:$0xf] }
  0xec   : > { %v812_v14 = vpop.permute.xlu0 %811 }
  0xed   : > { %vm814_vm1 = vcmp.eq.s32.totalorder %v812_v14, %v4690_v13  ;;  %v3083_v14 = vld [vmem:[#allocation10 + $0x54] sm:$0xf0] }
  0xee   : > { %vm3041_vm2 = vmpackc.low %vm814_vm1, %vm813_vm0 }
  0xef   : > { %3042 = vmatmul.msk.bf16.vlgmr.msra.gmra.mxu0 %vm3041_vm2, %v4373_v15  ;;  %v3089_v15 = vld [vmem:[#allocation10 + $0x50] sm:$0xf] }
 0x16c   : > { %v895_v17 = vpop.f32.mrf.mxu0 }
 0x16d   : > { %v896_v18 = vadd.f32 %v895_v17, %v836_v16  ;;  %v3599_v16 = vld [vmem:[#allocation10 + $0x58] sm:$0xf0]  ;;  %v3086_v17 = vor.u32 %v3597_v11, %v3083_v14 }
 0x16f   : > { %902 = vadd.xlane.f32.xlu1 %v896_v18  ;;  %1146 = vmatpush.bf16.msra.mxu2 %v3086_v17 }
 0x174   : > { %v897_v20 = vpop.f32.mrf.mxu0 }
 0x175   : > { %v898_v21 = vadd.f32 %v897_v20, %v837_v19  ;;  %v3069_v19 = vld [vmem:[#allocation10 + $0x30] sm:$0xf]  ;;  %v3595_v20 = vld [vmem:[#allocation10 + $0x38] sm:$0xf0] }
 0x176   : > { %v3070_v22 = vor.u32 %v3595_v20, %v3069_v19 }
 0x177   : > { %904 = vadd.xlane.f32.xlu1 %v898_v21 }
 0x178   : > { %1133 = vmatpush.bf16.msra.mxu1 %v3070_v22 }
 0x1e2   : > { %v903_v29 = vpop.xlane.xlu1 %902 }
 0x1e3   : > { %v913_v30 = vmul.f32 %v4694_v28, %v903_v29  ;;  %v3057_v29 = vld [vmem:[#allocation10 + $0x18] sm:$0xf] }
 0x1e5   : > { %v4697_v31 = vsub.f32 %v896_v18, %v913_v30  ;;  %v3090_v18 = vor.u32 %v3599_v16, %v3089_v15  ;;  %v3592_v30 = vld [vmem:[#allocation10 + $0x20] sm:$0xf0]  ;;  %v992_v15 = vld [vmem:[%s4984_s8] sm:$0x7] }
 0x1e6   : > { %v994_v16 = vperm.slane %v992_v15, 0 }
 0x1e7   : > { %v917_v32 = vmul.f32 %v4697_v31, %v4697_v31  ;;  %1160 = vmatpush.bf16.msra.mxu3 %v3090_v18 }
 0x1e9   : > { %919 = vadd.xlane.f32.xlu2 %v917_v32  ;;  %v3591_v32 = vld [vmem:[#allocation10 + $0x1c] sm:$0xf] }
 0x1ea   : > { %v905_v33 = vpop.xlane.xlu1 %904 }
 0x1eb   : > { %v914_v34 = vmul.f32 %v4694_v28, %v905_v33  ;;  %1161 = vmatpush.bf16.msra.mxu3 %v3078_v27  ;;  %v3058_v33 = vor.u32 %v3592_v30, %v3057_v29 }
 0x1ed   : > { %v4702_v35 = vsub.f32 %v898_v21, %v914_v34  ;;  %v3594_v21 = vld [vmem:[#allocation10 + $0x34] sm:$0xf]  ;;  %v3059_v34 = vld [vmem:[#allocation10 + $0x24] sm:$0xf0]  ;;  %1134 = vmatpush.bf16.msra.mxu1 %v3058_v33 }
 0x1ee   : > { %v3074_v26 = vor.u32 %v3594_v21, %v3071_v23  ;;  %v3062_v38 = vor.u32 %v3591_v32, %v3059_v34  ;;  %v995_v21 = vperm.slane %v992_v15, 1  ;;  %v996_v23 = vperm.slane %v992_v15, 2 }
 0x1ef   : > { %v918_v36 = vmul.f32 %v4702_v35, %v4702_v35 }
 0x1f0   : > { %1147 = vmatpush.bf16.msra.mxu2 %v3074_v26 }
 0x1f1   : > { %921 = vadd.xlane.f32.xlu2 %v918_v36  ;;  %v3065_v36 = vld [vmem:[#allocation10 + $0x20] sm:$0xf]  ;;  %1135 = vmatpush.bf16.msra.mxu1 %v3046_v44 }
 0x1f2   : > { %v3066_v39 = vor.u32 %v3593_v37, %v3065_v36 }
 0x1f4   : > { %1148 = vmatpush.bf16.msra.mxu2 %v3062_v38  ;;  %1162 = vmatpush.bf16.msra.mxu3 %v3066_v39 }
 0x1f8   : > { %1149 = vmatpush.bf16.msra.mxu2 %v3050_v49  ;;  %1163 = vmatpush.bf16.msra.mxu3 %v3054_v50 }
 0x25c   : > { %v920_v43 = vpop.xlane.xlu2 %919 }
 0x25d   : > { %v923_v48 = vmul.f32 %v920_v43, %v4694_v28  ;;  %v4727_v43 = vld [vmem:[%s681_s28] ss:$0 sm:$0xff] }
 0x25f   : > { %v925_v51 = vadd.f32 1e-12, %v923_v48 }
 0x261   : > { %3898 = vrsqrt.f32 %v925_v51  ;;  %vm933_vm5 = vweird.f32 %v925_v51 }
 0x264   : > { %v922_v52 = vpop.xlane.xlu2 %921 }
 0x265   : > { %v924_v53 = vmul.f32 %v922_v52, %v4694_v28 }
 0x267   : > { %v3899_v54 = vpop.eup %3898  ;;  %v926_v55 = vadd.f32 1e-12, %v924_v53 }
 0x268   : > { %v928_v56 = vmul.f32 %v3899_v54, %v925_v51  ;;  %vm934_vm4 = vweird.f32 %v3899_v54 }
 0x269   : > { %3900 = vrsqrt.f32 %v926_v55  ;;  %vm935_vm6 = vmor %vm933_vm5, %vm934_vm4  ;;  %vm943_vm8 = vweird.f32 %v926_v55 }
 0x26a   : > { %v929_v57 = vmul.f32 %v3899_v54, %v928_v56 }
 0x26c   : > { %v930_v58 = vmul.f32 0.5, %v929_v57 }
 0x26e   : > { %v931_v59 = vsub.f32 1.5, %v930_v58 }
 0x26f   : > { %v3901_v60 = vpop.eup %3900 }
 0x270   : > { %v932_v61 = vmul.f32 %v3899_v54, %v931_v59  ;;  %v938_v62 = vmul.f32 %v3901_v60, %v926_v55  ;;  %vm944_vm7 = vweird.f32 %v3901_v60 }
 0x271   : > { %vm945_vm9 = vmor %vm943_vm8, %vm944_vm7 }
 0x272   : > { %v939_v63 = vmul.f32 %v3901_v60, %v938_v62  ;;  %v936_v0 = vsel %vm935_vm6, %v3899_v54, %v932_v61 }
 0x273   : > { %v947_v3 = vmul.f32 %v936_v0, %v4697_v31 }
 0x274   : > { %v940_v1 = vmul.f32 0.5, %v939_v63 }
 0x275   : > { %v952_v8 = vmul.f32 %v3881_v4, %v947_v3 }
 0x276   : > { %v941_v2 = vsub.f32 1.5, %v940_v1 }
 0x277   : > { %v4710_v11 = vadd.f32 %v3882_v9, %v952_v8 }
 0x278   : > { %v942_v5 = vmul.f32 %v3901_v60, %v941_v2 }
 0x27a   : > { %v946_v6 = vsel %vm945_vm9, %v3901_v60, %v942_v5 }
 0x27b   : > { %v948_v7 = vmul.f32 %v946_v6, %v4702_v35 }
 0x27d   : > { %v953_v10 = vmul.f32 %v3881_v4, %v948_v7 }
 0x27f   : > { %v4712_v12 = vadd.f32 %v3882_v9, %v953_v10 }
 0x281   : > { %v959_v14 = vpack.c.bf16 %v4712_v12, %v4710_v11 }
 0x283   : > { %1136 = vmatmul.bf16.vlgmr.msra.gmra.mxu1 %v959_v14  ;;  %1150 = vmatmul.bf16.vlgmr.msra.gmra.mxu2 %v959_v14 }
 0x284   : > { %1164 = vmatmul.bf16.vlgmr.msra.gmra.mxu3 %v959_v14 }
 0x300   : > { %v1137_v31 = vpop.f32.mrf.mxu1 }
 0x301   : > { %v1138_v19 = vadd.f32 %v1137_v31, %v994_v16 }
 0x306   : > { %v1151_v35 = vpop.f32.mrf.mxu2 }
 0x307   : > { %v1165_v17 = vpop.f32.mrf.mxu3  ;;  %v1152_v25 = vadd.f32 %v1151_v35, %v995_v21 }
 0x308   : > { %v1139_v18 = vpop.f32.mrf.mxu1  ;;  %v1166_v29 = vadd.f32 %v1165_v17, %v996_v23 }
 0x309   : > { %v1140_v20 = vadd.f32 %v1139_v18, %v994_v16 }
 0x30b   : > { %v1170_v22 = vpack.c.bf16 %v1140_v20, %v1138_v19 }
 0x30d   : > { %1243 = vrot.lane.b32.xlu1 %v1170_v22, %s4375_s1 }
 0x30e   : > { %v1153_v24 = vpop.f32.mrf.mxu2 }
 0x30f   : > { %v1154_v26 = vadd.f32 %v1153_v24, %v995_v21  ;;  %v1167_v27 = vpop.f32.mrf.mxu3 }
 0x310   : > { %v1168_v30 = vadd.f32 %v1167_v27, %v996_v23 }
 0x311   : > { %v1171_v32 = vpack.c.bf16 %v1154_v26, %v1152_v25 }
 0x312   : > { %v1172_v33 = vpack.c.bf16 %v1168_v30, %v1166_v29 }
 0x313   : > { %1246 = vrot.lane.b32.xlu0 %v1171_v32, %s4375_s1  ;;  %v1178_v34 = vsel %vm1173_vm10, %v1171_v32, 0 }
 0x314   : > { %1235 = vmatpush.bf16.msrb.mxu1 %v1172_v33  ;;  %1187 = vmatpush.bf16.xpose.msrb.mxu2 %v1178_v34  ;;  %v3618_v34 = vld [vmem:[#allocation11 + $0x30] sm:$0xff] }
 0x31b   : > { %3139 = vmatmul.msk.bf16.vlgmr.msrb.gmra.mxu2 %vm1173_vm10, %v1170_v22 }
 0x37f   : > { %v1244_v38 = vpop.permute.xlu1 %1243 }
 0x385   : > { %v1247_v36 = vpop.permute.xlu0 %1246 }
 0x386   : > { %v1252_v37 = vsel %vm1173_vm10, %v1247_v36, 0  ;;  %v3617_v36 = vld [vmem:[#allocation11 + $0x28] sm:$0xff] }
 0x387   : > { %1261 = vmatpush.bf16.xpose.msra.mxu2 %v1252_v37  ;;  %v3616_v37 = vld [vmem:[#allocation11 + $0x20] sm:$0xff] }
 0x38e   : > { %3141 = vmatmul.msk.bf16.vlgmr.msra.gmra.mxu2 %vm1173_vm10, %v1244_v38  ;;  %v3615_v38 = vld [vmem:[#allocation11 + $0x18] sm:$0xff] }
 0x39e   : > { %v1189_v39 = vpop.f32.mrf.mxu2 }
 0x39f   : > { %v1194_v45 = vmul.f32 0.125, %v1189_v39  ;;  %v3614_v39 = vld [vmem:[#allocation11 + $0x10] sm:$0xff] }
 0x3a1   : > { %v1199_v49 = vadd.f32 %v4727_v43, %v1194_v45 }
 0x3a3   : > { %v1202_v52 = vsel %vm1201_vm11, %v1199_v49, -inf }
 0x3a6   : > { %v1191_v40 = vpop.f32.mrf.mxu2 }
 0x3a7   : > { %v1195_v51 = vmul.f32 0.125, %v1191_v40  ;;  %v3613_v40 = vld [vmem:[#allocation11 + $0x8] sm:$0xff] }
 0x3a9   : > { %v1200_v54 = vadd.f32 %v4727_v43, %v1195_v51  ;;  %v3884_v51 = vld [vmem:[#allocation13] ss:$0 sm:$0xff] }
 0x3ab   : > { %v1205_v55 = vsel %vm1201_vm11, %v1200_v54, -inf }
 0x411   : > { %v1263_v41 = vpop.f32.mrf.mxu2 }
 0x412   : > { %v1268_v42 = vmul.f32 0.125, %v1263_v41  ;;  %v3612_v41 = vld [vmem:[#allocation11] sm:$0xff] }
 0x414   : > { %v1270_v44 = vadd.f32 %v4727_v43, %v1268_v42 }
 0x416   : > { %v1272_v46 = vsel %vm1201_vm11, %v1270_v44, -inf }
 0x417   : > { %1273 = vmax.xlane.f32.xlu2 %v1272_v46 }
 0x419   : > { %v1265_v47 = vpop.f32.mrf.mxu2 }
 0x41a   : > { %v1269_v48 = vmul.f32 0.125, %v1265_v47 }
 0x41c   : > { %v1271_v50 = vadd.f32 %v4727_v43, %v1269_v48 }
 0x41e   : > { %v1275_v53 = vsel %vm1201_vm11, %v1271_v50, -inf }
 0x41f   : > { %1203 = vmax.xlane.f32.xlu2 %v1202_v52  ;;  %1276 = vmax.xlane.f32.xlu0 %v1275_v53 }
 0x427   : > { %1206 = vmax.xlane.f32.xlu2 %v1205_v55 }
 0x48a   : > { %v1274_v56 = vpop.xlane.xlu2 %1273 }
 0x48b   : > { %v1278_v57 = vsub.f32 %v1270_v44, %v1274_v56 }
 0x48d   : > { %v1280_v58 = vmul.f32 1.442695, %v1278_v57 }
 0x48f   : > { %3902 = vpow2.f32 %v1280_v58 }
 0x492   : > { %v1204_v59 = vpop.xlane.xlu2 %1203  ;;  %v1277_v60 = vpop.xlane.xlu0 %1276 }
 0x493   : > { %v1208_v61 = vsub.f32 %v1199_v49, %v1204_v59  ;;  %v1279_v62 = vsub.f32 %v1271_v50, %v1277_v60 }
 0x495   : > { %v3903_v63 = vpop.eup %3902  ;;  %v1210_v0 = vmul.f32 1.442695, %v1208_v61  ;;  %v1282_v1 = vmul.f32 1.442695, %v1279_v62 }
 0x496   : > { %v1284_v2 = vsel %vm1201_vm11, %v3903_v63, 0.0 }
 0x497   : > { %3904 = vpow2.f32 %v1210_v0  ;;  %1285 = vadd.xlane.f32.xlu2 %v1284_v2  ;;  %v3634_v2 = vld [vmem:[#allocation16 + $0x74] sm:$0xf] }
 0x498   : > { %3906 = vpow2.f32 %v1282_v1  ;;  %v3635_v1 = vld [vmem:[#allocation16 + $0x74] sm:$0xf0] }
 0x49a   : > { %v1207_v7 = vpop.xlane.xlu2 %1206 }
 0x49b   : > { %v1209_v8 = vsub.f32 %v1200_v54, %v1207_v7  ;;  %v3633_v7 = vld [vmem:[#allocation16 + $0x64] sm:$0xf0] }
 0x49d   : > { %v3905_v3 = vpop.eup %3904  ;;  %v1212_v9 = vmul.f32 1.442695, %v1209_v8  ;;  %v3632_v8 = vld [vmem:[#allocation16 + $0x64] sm:$0xf] }
 0x49e   : > { %v3907_v4 = vpop.eup %3906  ;;  %v1214_v5 = vsel %vm1201_vm11, %v3905_v3, 0.0 }
 0x49f   : > { %1215 = vadd.xlane.f32.xlu0 %v1214_v5  ;;  %v1287_v6 = vsel %vm1201_vm11, %v3907_v4, 0.0  ;;  %3908 = vpow2.f32 %v1212_v9 }
 0x4a0   : > { %1288 = vadd.xlane.f32.xlu1 %v1287_v6  ;;  %v3225_v6 = vld [vmem:[#allocation16 + $0x60] sm:$0xf] }
 0x4a1   : > { %v3226_v9 = vor.u32 %v3633_v7, %v3225_v6 }
 0x4a5   : > { %v3909_v10 = vpop.eup %3908 }
 0x4a6   : > { %v1217_v14 = vsel %vm1201_vm11, %v3909_v10, 0.0 }
 0x4af   : > { %1296 = vrot.lane.b32.xlu2 %v1172_v33, %s4375_s1  ;;  %v3619_v33 = vld [vmem:[#allocation11 + $0x38] sm:$0xff] }
 0x4b0   : > { %1395 = vmatpush.bf16.msrb.mxu0 %v3619_v33  ;;  %v3193_v33 = vld [vmem:[#allocation16 + $0x20] sm:$0xf] }
 0x4b4   : > { %1396 = vmatpush.bf16.msrb.mxu0 %v3618_v34  ;;  %v3625_v34 = vld [vmem:[#allocation16 + $0x24] sm:$0xf0] }
 0x4b8   : > { %1397 = vmatpush.bf16.msrb.mxu0 %v3617_v36  ;;  %v3624_v36 = vld [vmem:[#allocation16 + $0x24] sm:$0xf] }
 0x4bc   : > { %1398 = vmatpush.bf16.msrb.mxu0 %v3616_v37  ;;  %v3194_v37 = vor.u32 %v3625_v34, %v3193_v33  ;;  %v3646_v33 = vld [vmem:[#allocation17 + $0x50] sm:$0xff]  ;;  %v3636_v34 = vld [vmem:[#allocation17] sm:$0xff] }
 0x4c0   : > { %1399 = vmatpush.bf16.msrb.mxu0 %v3615_v38  ;;  %v3195_v38 = vld [vmem:[#allocation16 + $0x28] sm:$0xf0] }
 0x4c4   : > { %1400 = vmatpush.bf16.msrb.mxu0 %v3614_v39  ;;  %v3198_v39 = vor.u32 %v3624_v36, %v3195_v38  ;;  %v3645_v38 = vld [vmem:[#allocation17 + $0x48] sm:$0xff] }
 0x4c8   : > { %1401 = vmatpush.bf16.msrb.mxu0 %v3613_v40  ;;  %v3185_v40 = vld [vmem:[#allocation16 + $0x10] sm:$0xf] }
 0x4cc   : > { %1402 = vmatpush.bf16.msrb.mxu0 %v3612_v41  ;;  %v3623_v41 = vld [vmem:[#allocation16 + $0x14] sm:$0xf0] }
 0x4d8   : > { %1218 = vadd.xlane.f32.xlu2 %v1217_v14 }
 0x50a   : > { %v1286_v31 = vpop.xlane.xlu2 %1285 }
 0x50b   : > { %3910 = vrcp.f32 %v1286_v31  ;;  %v3217_v31 = vld [vmem:[#allocation16 + $0x50] sm:$0xf] }
 0x511   : > { %v3911_v35 = vpop.eup %3910 }
 0x512   : > { %v1297_v15 = vpop.permute.xlu2 %1296  ;;  %v1292_v18 = vmul.f32 %v3911_v35, %v3903_v63  ;;  %v1216_v21 = vpop.xlane.xlu0 %1215 }
 0x513   : > { %v1289_v16 = vpop.xlane.xlu1 %1288  ;;  %1309 = vmatpush.bf16.msrb.mxu3 %v1297_v15  ;;  %v3631_v15 = vld [vmem:[#allocation16 + $0x54] sm:$0xf0] }
 0x514   : > { %3912 = vrcp.f32 %v1289_v16  ;;  %v3630_v16 = vld [vmem:[#allocation16 + $0x54] sm:$0xf]  ;;  %v3218_v35 = vor.u32 %v3631_v15, %v3217_v31  ;;  %v3886_v15 = vld [vmem:[#allocation14] ss:$0 sm:$0xff] }
 0x515   : > { %3914 = vrcp.f32 %v1216_v21  ;;  %v3628_v21 = vld [vmem:[#allocation16 + $0x44] sm:$0xf] }
 0x51a   : > { %v3913_v17 = vpop.eup %3912 }
 0x51b   : > { %v1293_v19 = vmul.f32 %v3913_v17, %v3907_v4  ;;  %v3915_v23 = vpop.eup %3914  ;;  %v3235_v4 = vld [vmem:[#allocation16 + $0x78] sm:$0xf0] }
 0x51c   : > { %v1222_v25 = vmul.f32 %v3915_v23, %v3905_v3  ;;  %v3238_v5 = vor.u32 %v3634_v2, %v3235_v4  ;;  %v3219_v17 = vld [vmem:[#allocation16 + $0x58] sm:$0xf0]  ;;  %v3211_v23 = vld [vmem:[#allocation16 + $0x48] sm:$0xf0] }
 0x51d   : > { %v1294_v20 = vpack.c.bf16 %v1293_v19, %v1292_v18  ;;  %v3222_v18 = vor.u32 %v3630_v16, %v3219_v17  ;;  %v3209_v19 = vld [vmem:[#allocation16 + $0x40] sm:$0xf] }
 0x51e   : > { %1580 = vmatpush.bf16.msrb.mxu2 %v3238_v5 }
 0x51f   : > { %3142 = vmatmul.msk.bf16.vlgmr.msrb.gmra.mxu3 %vm1201_vm11, %v1294_v20  ;;  %v3629_v20 = vld [vmem:[#allocation16 + $0x44] sm:$0xf0] }
 0x54b   : > { %v1219_v22 = vpop.xlane.xlu2 %1218 }
 0x54c   : > { %3916 = vrcp.f32 %v1219_v22  ;;  %v3210_v22 = vor.u32 %v3629_v20, %v3209_v19  ;;  %v3642_v19 = vld [vmem:[#allocation17 + $0x30] sm:$0xff]  ;;  %v3651_v20 = vld [vmem:[#allocation17 + $0x78] sm:$0xff] }
 0x54d   : > { %1778 = vmatpush.bf16.msra.mxu0 %v3651_v20 }
 0x552   : > { %v3917_v24 = vpop.eup %3916 }
 0x553   : > { %v1223_v26 = vmul.f32 %v3917_v24, %v3909_v10  ;;  %v3227_v10 = vld [vmem:[#allocation16 + $0x68] sm:$0xf0]  ;;  %v3214_v24 = vor.u32 %v3628_v21, %v3211_v23 }
 0x554   : > { %v3230_v14 = vor.u32 %v3632_v8, %v3227_v10  ;;  %v3885_v8 = vld [vmem:[%s4931_s11] ss:$0 sm:$0xff]  ;;  %v3641_v21 = vld [vmem:[#allocation17 + $0x28] sm:$0xff] }
 0x555   : > { %v1224_v27 = vpack.c.bf16 %v1223_v26, %v1222_v25  ;;  %v3201_v25 = vld [vmem:[#allocation16 + $0x30] sm:$0xf]  ;;  %v3627_v26 = vld [vmem:[#allocation16 + $0x34] sm:$0xf0]  ;;  %v3649_v23 = vld [vmem:[#allocation17 + $0x68] sm:$0xff] }
 0x556   : > { %1581 = vmatpush.bf16.msrb.mxu2 %v3230_v14 }
 0x557   : > { %3140 = vmatmul.msk.bf16.vlgmr.msrb.gmra.mxu1 %vm1201_vm11, %v1224_v27  ;;  %v3626_v27 = vld [vmem:[#allocation16 + $0x34] sm:$0xf] }
 0x55a   : > { %1582 = vmatpush.bf16.msrb.mxu2 %v3222_v18  ;;  %v3643_v18 = vld [vmem:[#allocation17 + $0x38] sm:$0xff] }
 0x55b   : > { %1764 = vmatpush.bf16.msra.mxu3 %v3643_v18 }
 0x55e   : > { %1583 = vmatpush.bf16.msrb.mxu2 %v3214_v24  ;;  %v3639_v24 = vld [vmem:[#allocation17 + $0x18] sm:$0xff] }
 0x55f   : > { %1765 = vmatpush.bf16.msra.mxu3 %v3642_v19 }
 0x563   : > { %1766 = vmatpush.bf16.msra.mxu3 %v3641_v21 }
 0x5a2   : > { %v1311_v29 = vpop.f32.mrf.mxu3 }
 0x5aa   : > { %v1313_v30 = vpop.f32.mrf.mxu3 }
 0x5ab   : > { %v3870_v32 = vpack.i.bf16 %v1313_v30, %v1311_v29  ;;  %v3202_v29 = vor.u32 %v3627_v26, %v3201_v25  ;;  %v3203_v30 = vld [vmem:[#allocation16 + $0x38] sm:$0xf0]  ;;  %v3648_v25 = vld [vmem:[#allocation17 + $0x60] sm:$0xff]  ;;  %v3638_v26 = vld [vmem:[#allocation17 + $0x10] sm:$0xff] }
 0x5ad   : > { %3871 = vrot.lane.b32.xlu0 %v3870_v32, %s4375_s1  ;;  %v3206_v32 = vor.u32 %v3626_v27, %v3203_v30  ;;  %v3647_v27 = vld [vmem:[#allocation17 + $0x58] sm:$0xff]  ;;  %v3637_v30 = vld [vmem:[#allocation17 + $0x8] sm:$0xff] }
 0x5af   : > { %1584 = vmatpush.bf16.msrb.mxu2 %v3206_v32 }
 0x5b3   : > { %1585 = vmatpush.bf16.msrb.mxu2 %v3198_v39 }
 0x5d4   : > { %v1237_v42 = vpop.f32.mrf.mxu1 }
 0x5dc   : > { %v1239_v47 = vpop.f32.mrf.mxu1 }
 0x61f   : > { %v3872_v44 = vpop.permute.xlu0 %3871 }
 0x620   : > { %v3874_v45 = vunpack.i.h.bf16 %v3872_v44  ;;  %v3873_v46 = vunpack.i.l.bf16 %v3872_v44  ;;  %v3186_v44 = vor.u32 %v3623_v41, %v3185_v40 }
 0x622   : > { %v1324_v48 = vsel %vm1173_vm10, %v1237_v42, %v3873_v46  ;;  %v1325_v49 = vsel %vm1173_vm10, %v1239_v47, %v3874_v45  ;;  %v3622_v42 = vld [vmem:[#allocation16 + $0x14] sm:$0xf]  ;;  %v3187_v45 = vld [vmem:[#allocation16 + $0x18] sm:$0xf0]  ;;  %v3177_v47 = vld [vmem:[#allocation16] sm:$0xf] }
 0x623   : > { %v1326_v50 = vpack.c.bf16 %v1325_v49, %v1324_v48  ;;  %v3190_v46 = vor.u32 %v3622_v42, %v3187_v45  ;;  %v3621_v48 = vld [vmem:[#allocation16 + $0x4] sm:$0xf0]  ;;  %v3620_v49 = vld [vmem:[#allocation16 + $0x4] sm:$0xf] }
 0x624   : > { %v3644_v42 = vld [vmem:[#allocation17 + $0x40] sm:$0xff] }
 0x625   : > { %1403 = vmatmul.bf16.vlgmr.msrb.gmra.mxu0 %v1326_v50  ;;  %1586 = vmatpush.bf16.msrb.mxu2 %v3190_v46 }
 0x6a2   : > { %v1404_v52 = vpop.f32.mrf.mxu0 }
 0x6a3   : > { %v1405_v53 = vadd.f32 %v3884_v51, %v1404_v52  ;;  %v3179_v52 = vld [vmem:[#allocation16 + $0x8] sm:$0xf0] }
 0x6a5   : > { %v1409_v54 = vadd.f32 %v1405_v53, %v4710_v11 }
 0x6a7   : > { %1413 = vadd.xlane.f32.xlu1 %v1409_v54 }
 0x6aa   : > { %v1406_v55 = vpop.f32.mrf.mxu0 }
 0x6ab   : > { %v1407_v56 = vadd.f32 %v3884_v51, %v1406_v55  ;;  %v3178_v51 = vor.u32 %v3621_v48, %v3177_v47 }
 0x6ad   : > { %v1410_v57 = vadd.f32 %v1407_v56, %v4712_v12  ;;  %v3233_v12 = vld [vmem:[#allocation16 + $0x70] sm:$0xf] }
 0x6ae   : > { %v3234_v3 = vor.u32 %v3635_v1, %v3233_v12 }
 0x6af   : > { %1415 = vadd.xlane.f32.xlu1 %v1410_v57 }
 0x6b0   : > { %1566 = vmatpush.bf16.msra.mxu1 %v3234_v3 }
 0x6b4   : > { %1567 = vmatpush.bf16.msra.mxu1 %v3226_v9 }
 0x6b8   : > { %1568 = vmatpush.bf16.msra.mxu1 %v3218_v35 }
 0x6bc   : > { %1569 = vmatpush.bf16.msra.mxu1 %v3210_v22  ;;  %v3640_v22 = vld [vmem:[#allocation17 + $0x20] sm:$0xff] }
 0x6bd   : > { %1767 = vmatpush.bf16.msra.mxu3 %v3640_v22 }
 0x6c0   : > { %1570 = vmatpush.bf16.msra.mxu1 %v3202_v29  ;;  %v1480_v29 = vld [vmem:[%s4934_s14] sm:$0x3] }
 0x6c1   : > { %1768 = vmatpush.bf16.msra.mxu3 %v3639_v24  ;;  %v1482_v32 = vperm.slane %v1480_v29, 0  ;;  %v1483_v40 = vperm.slane %v1480_v29, 1 }
 0x6c4   : > { %1571 = vmatpush.bf16.msra.mxu1 %v3194_v37 }
 0x6c5   : > { %1769 = vmatpush.bf16.msra.mxu3 %v3638_v26 }
 0x6c8   : > { %1572 = vmatpush.bf16.msra.mxu1 %v3186_v44 }
 0x6c9   : > { %1770 = vmatpush.bf16.msra.mxu3 %v3637_v30 }
 0x6cc   : > { %1573 = vmatpush.bf16.msra.mxu1 %v3178_v51 }
 0x6cd   : > { %1771 = vmatpush.bf16.msra.mxu3 %v3636_v34 }
 0x71a   : > { %v1414_v58 = vpop.xlane.xlu1 %1413 }
 0x71b   : > { %v1417_v59 = vmul.f32 %v1414_v58, %v4694_v28 }
 0x71d   : > { %v4750_v60 = vsub.f32 %v1409_v54, %v1417_v59  ;;  %v3182_v54 = vor.u32 %v3620_v49, %v3179_v52 }
 0x71f   : > { %v1421_v61 = vmul.f32 %v4750_v60, %v4750_v60  ;;  %1587 = vmatpush.bf16.msrb.mxu2 %v3182_v54 }
 0x721   : > { %1423 = vadd.xlane.f32.xlu0 %v1421_v61 }
 0x722   : > { %v1416_v62 = vpop.xlane.xlu1 %1415 }
 0x723   : > { %v1418_v63 = vmul.f32 %v1416_v62, %v4694_v28 }
 0x725   : > { %v4755_v0 = vsub.f32 %v1410_v57, %v1418_v63 }
 0x727   : > { %v1422_v11 = vmul.f32 %v4755_v0, %v4755_v0 }
 0x729   : > { %1425 = vadd.xlane.f32.xlu1 %v1422_v11 }
 0x794   : > { %v1424_v50 = vpop.xlane.xlu0 %1423 }
 0x795   : > { %v1427_v53 = vmul.f32 %v1424_v50, %v4694_v28 }
 0x797   : > { %v1429_v55 = vadd.f32 1e-12, %v1427_v53 }
 0x799   : > { %3918 = vrsqrt.f32 %v1429_v55  ;;  %vm1437_vm13 = vweird.f32 %v1429_v55 }
 0x79c   : > { %v1426_v56 = vpop.xlane.xlu1 %1425 }
 0x79d   : > { %v1428_v57 = vmul.f32 %v1426_v56, %v4694_v28 }
 0x79f   : > { %v3919_v58 = vpop.eup %3918  ;;  %v1430_v59 = vadd.f32 1e-12, %v1428_v57 }
 0x7a0   : > { %v1432_v61 = vmul.f32 %v3919_v58, %v1429_v55  ;;  %vm1438_vm12 = vweird.f32 %v3919_v58 }
 0x7a1   : > { %3920 = vrsqrt.f32 %v1430_v59  ;;  %vm1439_vm14 = vmor %vm1437_vm13, %vm1438_vm12  ;;  %vm1447_vm0 = vweird.f32 %v1430_v59 }
 0x7a2   : > { %v1433_v62 = vmul.f32 %v3919_v58, %v1432_v61 }
 0x7a4   : > { %v1434_v63 = vmul.f32 0.5, %v1433_v62 }
 0x7a6   : > { %v1435_v11 = vsub.f32 1.5, %v1434_v63 }
 0x7a7   : > { %v3921_v12 = vpop.eup %3920 }
 0x7a8   : > { %v1436_v1 = vmul.f32 %v3919_v58, %v1435_v11  ;;  %v1442_v2 = vmul.f32 %v3921_v12, %v1430_v59  ;;  %vm1448_vm15 = vweird.f32 %v3921_v12 }
 0x7a9   : > { %vm1449_vm1 = vmor %vm1447_vm0, %vm1448_vm15 }
 0x7aa   : > { %v1443_v3 = vmul.f32 %v3921_v12, %v1442_v2  ;;  %v1440_v4 = vsel %vm1439_vm14, %v3919_v58, %v1436_v1 }
 0x7ab   : > { %v1451_v7 = vmul.f32 %v1440_v4, %v4750_v60 }
 0x7ac   : > { %v1444_v5 = vmul.f32 0.5, %v1443_v3 }
 0x7ad   : > { %v1456_v31 = vmul.f32 %v3885_v8, %v1451_v7 }
 0x7ae   : > { %v1445_v6 = vsub.f32 1.5, %v1444_v5 }
 0x7af   : > { %v4766_v35 = vadd.f32 %v3886_v15, %v1456_v31 }
 0x7b0   : > { %v1446_v9 = vmul.f32 %v3921_v12, %v1445_v6 }
 0x7b2   : > { %v1450_v10 = vsel %vm1449_vm1, %v3921_v12, %v1446_v9 }
 0x7b3   : > { %v1452_v14 = vmul.f32 %v1450_v10, %v4755_v0  ;;  %v3650_v0 = vld [vmem:[#allocation17 + $0x70] sm:$0xff] }
 0x7b4   : > { %1779 = vmatpush.bf16.msra.mxu0 %v3650_v0 }
 0x7b5   : > { %v1457_v16 = vmul.f32 %v3885_v8, %v1452_v14 }
 0x7b7   : > { %v4768_v17 = vadd.f32 %v3886_v15, %v1457_v16 }
 0x7b8   : > { %1780 = vmatpush.bf16.msra.mxu0 %v3649_v23  ;;  %v3887_v23 = vld [vmem:[%s4985_s23] ss:$0 sm:$0xff] }
 0x7b9   : > { %v1463_v60 = vpack.c.bf16 %v4768_v17, %v4766_v35 }
 0x7bb   : > { %1574 = vmatmul.bf16.vlgmr.msra.gmra.mxu1 %v1463_v60  ;;  %1588 = vmatmul.bf16.vlgmr.msrb.gmra.mxu2 %v1463_v60 }
 0x7bc   : > { %1781 = vmatpush.bf16.msra.mxu0 %v3648_v25 }
 0x7c0   : > { %1782 = vmatpush.bf16.msra.mxu0 %v3647_v27 }
 0x7c4   : > { %1783 = vmatpush.bf16.msra.mxu0 %v3646_v33 }
 0x7c8   : > { %1784 = vmatpush.bf16.msra.mxu0 %v3645_v38 }
 0x7cc   : > { %1785 = vmatpush.bf16.msra.mxu0 %v3644_v42 }
 0x838   : > { %v1575_v36 = vpop.f32.mrf.mxu1 }
 0x839   : > { %v1576_v37 = vadd.f32 %v1575_v36, %v1482_v32 }
 0x83b   : > { %v1594_v39 = vmul.f32 %v1576_v37, %v1576_v37 }
 0x83d   : > { %v1598_v41 = vmul.f32 %v1594_v39, %v1576_v37 }
 0x83e   : > { %v1589_v44 = vpop.f32.mrf.mxu2 }
 0x83f   : > { %v1602_v45 = vmul.f32 0.044715, %v1598_v41  ;;  %v1590_v46 = vadd.f32 %v1589_v44, %v1483_v40 }
 0x840   : > { %v1577_v47 = vpop.f32.mrf.mxu1 }
 0x841   : > { %v1606_v48 = vadd.f32 %v1602_v45, %v1576_v37  ;;  %v1595_v49 = vmul.f32 %v1590_v46, %v1590_v46  ;;  %v1578_v50 = vadd.f32 %v1577_v47, %v1482_v32  ;;  %v3674_v45 = vld [vmem:[#allocation10 + $0x170] sm:$0xf0] }
 0x843   : > { %v1610_v51 = vmul.f32 0.7978846, %v1606_v48  ;;  %v1599_v52 = vmul.f32 %v1595_v49, %v1590_v46  ;;  %v1596_v53 = vmul.f32 %v1578_v50, %v1578_v50  ;;  %v3392_v48 = vld [vmem:[#allocation10 + $0x174] sm:$0xf0]  ;;  %v3398_v49 = vld [vmem:[#allocation10 + $0x170] sm:$0xf] }
 0x845   : > { %v1603_v54 = vmul.f32 0.044715, %v1599_v52  ;;  %v1600_v55 = vmul.f32 %v1596_v53, %v1578_v50  ;;  %3922 = vtanh.f32 %v1610_v51  ;;  %v3378_v53 = vld [vmem:[#allocation10 + $0x150] sm:$0xf] }
 0x846   : > { %v1591_v56 = vpop.f32.mrf.mxu2 }
 0x847   : > { %v1607_v57 = vadd.f32 %v1603_v54, %v1590_v46  ;;  %v1604_v58 = vmul.f32 0.044715, %v1600_v55  ;;  %v1592_v59 = vadd.f32 %v1591_v56, %v1483_v40  ;;  %v3671_v54 = vld [vmem:[#allocation10 + $0x158] sm:$0xf0]  ;;  %v3670_v55 = vld [vmem:[#allocation10 + $0x154] sm:$0xf] }
 0x848   : > { %v3379_v56 = vor.u32 %v3671_v54, %v3378_v53  ;;  %v3308_v53 = vld [vmem:[#allocation10 + $0xcc] sm:$0xf0]  ;;  %v3314_v54 = vld [vmem:[#allocation10 + $0xc8] sm:$0xf] }
 0x849   : > { %v1611_v61 = vmul.f32 0.7978846, %v1607_v57  ;;  %v1608_v62 = vadd.f32 %v1604_v58, %v1578_v50  ;;  %v1597_v63 = vmul.f32 %v1592_v59, %v1592_v59  ;;  %v3380_v57 = vld [vmem:[#allocation10 + $0x15c] sm:$0xf0]  ;;  %v3386_v58 = vld [vmem:[#allocation10 + $0x158] sm:$0xf] }
 0x84b   : > { %v1612_v11 = vmul.f32 0.7978846, %v1608_v62  ;;  %v1601_v12 = vmul.f32 %v1597_v63, %v1592_v59  ;;  %3924 = vtanh.f32 %v1611_v61  ;;  %v3923_v1 = vpop.eup %3922  ;;  %v3383_v61 = vor.u32 %v3670_v55, %v3380_v57  ;;  %v3366_v63 = vld [vmem:[#allocation10 + $0x138] sm:$0xf]  ;;  %v3654_v55 = vld [vmem:[#allocation10 + $0xd0] sm:$0xf0] }
 0x84c   : > { %v1618_v4 = vadd.f32 1.0, %v3923_v1 }
 0x84d   : > { %3926 = vtanh.f32 %v1612_v11  ;;  %v1605_v2 = vmul.f32 0.044715, %v1601_v12  ;;  %v3668_v11 = vld [vmem:[#allocation10 + $0x140] sm:$0xf0]  ;;  %v3667_v12 = vld [vmem:[#allocation10 + $0x13c] sm:$0xf] }
 0x84e   : > { %v1622_v8 = vmul.f32 0.5, %v1618_v4  ;;  %v3367_v1 = vor.u32 %v3668_v11, %v3366_v63  ;;  %v3669_v4 = vld [vmem:[#allocation10 + $0x148] sm:$0xf0] }
 0x84f   : > { %v1609_v3 = vadd.f32 %v1605_v2, %v1592_v59  ;;  %v3368_v2 = vld [vmem:[#allocation10 + $0x144] sm:$0xf0] }
 0x850   : > { %v1626_v31 = vmul.f32 %v1622_v8, %v1576_v37  ;;  %v3665_v8 = vld [vmem:[#allocation10 + $0x128] sm:$0xf0] }
 0x851   : > { %v1613_v5 = vmul.f32 0.7978846, %v1609_v3  ;;  %v3925_v6 = vpop.eup %3924  ;;  %v3374_v3 = vld [vmem:[#allocation10 + $0x140] sm:$0xf] }
 0x852   : > { %v1619_v10 = vadd.f32 1.0, %v3925_v6  ;;  %v3375_v6 = vor.u32 %v3669_v4, %v3374_v3 }
 0x853   : > { %v3927_v7 = vpop.eup %3926  ;;  %3928 = vtanh.f32 %v1613_v5  ;;  %v3371_v5 = vor.u32 %v3667_v12, %v3368_v2 }
 0x854   : > { %v1620_v9 = vadd.f32 1.0, %v3927_v7  ;;  %v1623_v60 = vmul.f32 0.5, %v1619_v10  ;;  %v3354_v7 = vld [vmem:[#allocation10 + $0x120] sm:$0xf] }
 0x855   : > { %v3355_v10 = vor.u32 %v3665_v8, %v3354_v7 }
 0x856   : > { %v1624_v14 = vmul.f32 0.5, %v1620_v9  ;;  %v1627_v21 = vmul.f32 %v1623_v60, %v1590_v46  ;;  %v3673_v46 = vld [vmem:[#allocation10 + $0x16c] sm:$0xf]  ;;  %v3664_v9 = vld [vmem:[#allocation10 + $0x124] sm:$0xf] }
 0x857   : > { %v3395_v51 = vor.u32 %v3673_v46, %v3392_v48  ;;  %v3306_v48 = vld [vmem:[#allocation10 + $0xc0] sm:$0xf] }
 0x858   : > { %v1628_v15 = vmul.f32 %v1624_v14, %v1578_v50  ;;  %v3675_v50 = vld [vmem:[#allocation10 + $0x178] sm:$0xf0]  ;;  %v3356_v14 = vld [vmem:[#allocation10 + $0x12c] sm:$0xf0] }
 0x859   : > { %v3929_v16 = vpop.eup %3928  ;;  %v3399_v52 = vor.u32 %v3675_v50, %v3398_v49  ;;  %2031 = vmatpush.bf16.msra.mxu2 %v3395_v51  ;;  %v3653_v49 = vld [vmem:[#allocation10 + $0xc8] sm:$0xf0]  ;;  %v3652_v50 = vld [vmem:[#allocation10 + $0xc4] sm:$0xf] }
 0x85a   : > { %v1621_v18 = vadd.f32 1.0, %v3929_v16  ;;  %v1630_v19 = vpack.c.bf16 %v1628_v15, %v1626_v31  ;;  %v3362_v31 = vld [vmem:[#allocation10 + $0x128] sm:$0xf]  ;;  %v3666_v15 = vld [vmem:[#allocation10 + $0x130] sm:$0xf0]  ;;  %v3359_v16 = vor.u32 %v3664_v9, %v3356_v14  ;;  %v3311_v57 = vor.u32 %v3652_v50, %v3308_v53 }
 0x85b   : > { %2045 = vmatpush.bf16.msrb.mxu3 %v3399_v52  ;;  %v3363_v60 = vor.u32 %v3666_v15, %v3362_v31  ;;  %v3307_v52 = vor.u32 %v3653_v49, %v3306_v48  ;;  %v3888_v31 = vld [vmem:[%s4986_s22] ss:$0 sm:$0xff] }
 0x85c   : > { %v1625_v20 = vmul.f32 0.5, %v1621_v18  ;;  %1772 = vmatmul.bf16.vlgmr.msra.gmra.mxu3 %v1630_v19  ;;  %v3342_v18 = vld [vmem:[#allocation10 + $0x108] sm:$0xf]  ;;  %v3662_v19 = vld [vmem:[#allocation10 + $0x110] sm:$0xf0] }
 0x85d   : > { %2032 = vmatpush.bf16.msra.mxu2 %v3383_v61 }
 0x85e   : > { %v1629_v0 = vmul.f32 %v1625_v20, %v1592_v59  ;;  %v3672_v59 = vld [vmem:[#allocation10 + $0x160] sm:$0xf0]  ;;  %v3661_v20 = vld [vmem:[#allocation10 + $0x10c] sm:$0xf] }
 0x85f   : > { %v3387_v62 = vor.u32 %v3672_v59, %v3386_v58  ;;  %v3315_v58 = vor.u32 %v3654_v55, %v3314_v54 }
 0x860   : > { %v1631_v22 = vpack.c.bf16 %v1629_v0, %v1627_v21  ;;  %v3343_v21 = vor.u32 %v3662_v19, %v3342_v18  ;;  %v3344_v0 = vld [vmem:[#allocation10 + $0x114] sm:$0xf0]  ;;  %v3889_v19 = vld [vmem:[%s4987_s3] ss:$0 sm:$0xff] }
 0x861   : > { %2046 = vmatpush.bf16.msrb.mxu3 %v3387_v62  ;;  %2033 = vmatpush.bf16.msra.mxu2 %v3371_v5 }
 0x862   : > { %1786 = vmatmul.bf16.vlgmr.msra.gmra.mxu0 %v1631_v22  ;;  %v3350_v22 = vld [vmem:[#allocation10 + $0x110] sm:$0xf] }
 0x865   : > { %2047 = vmatpush.bf16.msrb.mxu3 %v3375_v6  ;;  %2034 = vmatpush.bf16.msra.mxu2 %v3359_v16 }
 0x869   : > { %2048 = vmatpush.bf16.msrb.mxu3 %v3363_v60 }
 0x8df   : > { %v1773_v24 = vpop.f32.mrf.mxu3  ;;  %v1787_v25 = vpop.f32.mrf.mxu0 }
 0x8e0   : > { %v1774_v26 = vadd.f32 %v3887_v23, %v1773_v24  ;;  %v3347_v24 = vor.u32 %v3661_v20, %v3344_v0 }
 0x8e2   : > { %v1788_v27 = vadd.f32 %v1787_v25, %v1774_v26  ;;  %2035 = vmatpush.bf16.msra.mxu2 %v3347_v24  ;;  %v3330_v26 = vld [vmem:[#allocation10 + $0xf0] sm:$0xf] }
 0x8e4   : > { %v1792_v29 = vadd.f32 %v1788_v27, %v4766_v35  ;;  %v3659_v27 = vld [vmem:[#allocation10 + $0xf8] sm:$0xf0] }
 0x8e6   : > { %1796 = vadd.xlane.f32.xlu1 %v1792_v29 }
 0x8e7   : > { %v1775_v30 = vpop.f32.mrf.mxu3  ;;  %v1789_v33 = vpop.f32.mrf.mxu0 }
 0x8e8   : > { %v1776_v32 = vadd.f32 %v3887_v23, %v1775_v30  ;;  %v3663_v23 = vld [vmem:[#allocation10 + $0x118] sm:$0xf0]  ;;  %v3331_v30 = vor.u32 %v3659_v27, %v3330_v26 }
 0x8e9   : > { %v3351_v25 = vor.u32 %v3663_v23, %v3350_v22 }
 0x8ea   : > { %v1790_v34 = vadd.f32 %v1789_v33, %v1776_v32  ;;  %v3332_v32 = vld [vmem:[#allocation10 + $0xfc] sm:$0xf0]  ;;  %v3338_v33 = vld [vmem:[#allocation10 + $0xf8] sm:$0xf] }
 0x8eb   : > { %2049 = vmatpush.bf16.msrb.mxu3 %v3351_v25 }
 0x8ec   : > { %v1793_v36 = vadd.f32 %v1790_v34, %v4768_v17  ;;  %v3390_v17 = vld [vmem:[#allocation10 + $0x168] sm:$0xf]  ;;  %v3660_v34 = vld [vmem:[#allocation10 + $0x100] sm:$0xf0] }
 0x8ed   : > { %v3391_v47 = vor.u32 %v3674_v45, %v3390_v17  ;;  %v3326_v17 = vld [vmem:[#allocation10 + $0xe0] sm:$0xf]  ;;  %v3657_v45 = vld [vmem:[#allocation10 + $0xe8] sm:$0xf0] }
 0x8ee   : > { %1798 = vadd.xlane.f32.xlu2 %v1793_v36 }
 0x8ef   : > { %2017 = vmatpush.bf16.msrb.mxu1 %v3391_v47  ;;  %v3327_v47 = vor.u32 %v3657_v45, %v3326_v17 }
 0x8f3   : > { %2018 = vmatpush.bf16.msrb.mxu1 %v3379_v56 }
 0x8f7   : > { %2019 = vmatpush.bf16.msrb.mxu1 %v3367_v1 }
 0x8fb   : > { %2020 = vmatpush.bf16.msrb.mxu1 %v3355_v10 }
 0x8ff   : > { %2021 = vmatpush.bf16.msrb.mxu1 %v3343_v21 }
 0x903   : > { %2022 = vmatpush.bf16.msrb.mxu1 %v3331_v30 }
 0x959   : > { %v1797_v37 = vpop.xlane.xlu1 %1796 }
 0x95a   : > { %v1800_v38 = vmul.f32 %v1797_v37, %v4694_v28  ;;  %v3339_v37 = vor.u32 %v3660_v34, %v3338_v33 }
 0x95c   : > { %v4781_v39 = vsub.f32 %v1792_v29, %v1800_v38  ;;  %v3658_v29 = vld [vmem:[#allocation10 + $0xf4] sm:$0xf]  ;;  %2050 = vmatpush.bf16.msrb.mxu3 %v3339_v37  ;;  %v3318_v38 = vld [vmem:[#allocation10 + $0xd8] sm:$0xf] }
 0x95e   : > { %v1804_v40 = vmul.f32 %v4781_v39, %v4781_v39 }
 0x960   : > { %1806 = vadd.xlane.f32.xlu1 %v1804_v40  ;;  %v3656_v40 = vld [vmem:[#allocation10 + $0xe0] sm:$0xf0]  ;;  %2051 = vmatpush.bf16.msrb.mxu3 %v3327_v47 }
 0x961   : > { %v1799_v41 = vpop.xlane.xlu2 %1798 }
 0x962   : > { %v1801_v35 = vmul.f32 %v1799_v41, %v4694_v28  ;;  %v3655_v41 = vld [vmem:[#allocation10 + $0xdc] sm:$0xf] }
 0x964   : > { %v4786_v42 = vsub.f32 %v1793_v36, %v1801_v35  ;;  %v3335_v36 = vor.u32 %v3658_v29, %v3332_v32  ;;  %v3319_v35 = vor.u32 %v3656_v40, %v3318_v38  ;;  %2052 = vmatpush.bf16.msrb.mxu3 %v3315_v58 }
 0x966   : > { %v1805_v44 = vmul.f32 %v4786_v42, %v4786_v42  ;;  %2036 = vmatpush.bf16.msra.mxu2 %v3335_v36  ;;  %2023 = vmatpush.bf16.msrb.mxu1 %v3319_v35 }
 0x968   : > { %1808 = vadd.xlane.f32.xlu2 %v1805_v44  ;;  %v3320_v44 = vld [vmem:[#allocation10 + $0xe4] sm:$0xf0] }
 0x969   : > { %v3323_v46 = vor.u32 %v3655_v41, %v3320_v44 }
 0x96a   : > { %2024 = vmatpush.bf16.msrb.mxu1 %v3307_v52 }
 0x96b   : > { %2037 = vmatpush.bf16.msra.mxu2 %v3323_v46 }
 0x96f   : > { %2038 = vmatpush.bf16.msra.mxu2 %v3311_v57 }
 0x9d3   : > { %v1807_v51 = vpop.xlane.xlu1 %1806 }
 0x9d4   : > { %v1810_v56 = vmul.f32 %v1807_v51, %v4694_v28 }
 0x9d6   : > { %v1812_v59 = vadd.f32 1e-12, %v1810_v56 }
 0x9d8   : > { %3930 = vrsqrt.f32 %v1812_v59  ;;  %vm1820_vm3 = vweird.f32 %v1812_v59 }
 0x9db   : > { %v1809_v61 = vpop.xlane.xlu2 %1808 }
 0x9dc   : > { %v1811_v62 = vmul.f32 %v1809_v61, %v4694_v28 }
 0x9de   : > { %v3931_v63 = vpop.eup %3930  ;;  %v1813_v11 = vadd.f32 1e-12, %v1811_v62 }
 0x9df   : > { %v1815_v12 = vmul.f32 %v3931_v63, %v1812_v59  ;;  %vm1821_vm2 = vweird.f32 %v3931_v63 }
 0x9e0   : > { %3932 = vrsqrt.f32 %v1813_v11  ;;  %vm1822_vm4 = vmor %vm1820_vm3, %vm1821_vm2  ;;  %vm1830_vm6 = vweird.f32 %v1813_v11 }
 0x9e1   : > { %v1816_v1 = vmul.f32 %v3931_v63, %v1815_v12 }
 0x9e3   : > { %v1817_v2 = vmul.f32 0.5, %v1816_v1 }
 0x9e5   : > { %v1818_v3 = vsub.f32 1.5, %v1817_v2 }
 0x9e6   : > { %v3933_v4 = vpop.eup %3932 }
 0x9e7   : > { %v1819_v5 = vmul.f32 %v3931_v63, %v1818_v3  ;;  %v1825_v6 = vmul.f32 %v3933_v4, %v1813_v11  ;;  %vm1831_vm5 = vweird.f32 %v3933_v4 }
 0x9e8   : > { %vm1832_vm7 = vmor %vm1830_vm6, %vm1831_vm5 }
 0x9e9   : > { %v1826_v7 = vmul.f32 %v3933_v4, %v1825_v6  ;;  %v1823_v8 = vsel %vm1822_vm4, %v3931_v63, %v1819_v5  ;;  %v3966_v63 = vld [vmem:[%s681_s28] ss:$0 sm:$0xff]  ;;  %s4988_s28 = sld [smem:[#allocation28_spill]] }
 0x9ea   : > { %v1834_v14 = vmul.f32 %v1823_v8, %v4781_v39 }
 0x9eb   : > { %v1827_v9 = vmul.f32 0.5, %v1826_v7 }
 0x9ec   : > { %v1839_v18 = vmul.f32 %v3888_v31, %v1834_v14 }
 0x9ed   : > { %v1828_v10 = vsub.f32 1.5, %v1827_v9 }
 0x9ee   : > { %v4800_v21 = vadd.f32 %v3889_v19, %v1839_v18 }
 0x9ef   : > { %v1829_v15 = vmul.f32 %v3933_v4, %v1828_v10 }
 0x9f1   : > { %v1833_v16 = vsel %vm1832_vm7, %v3933_v4, %v1829_v15 }
 0x9f2   : > { %v1835_v60 = vmul.f32 %v1833_v16, %v4786_v42  ;;  %v3303_v42 = vld [vmem:[%s4984_s8 + $0x3] sm:$0x7] }
 0x9f3   : > { %v1883_v23 = vperm.slane %v3303_v42, 0  ;;  %v1884_v30 = vperm.slane %v3303_v42, 1  ;;  %v1885_v33 = vperm.slane %v3303_v42, 2 }
 0x9f4   : > { %v1840_v20 = vmul.f32 %v3888_v31, %v1835_v60 }
 0x9f6   : > { %v4802_v0 = vadd.f32 %v3889_v19, %v1840_v20 }
 0x9f8   : > { %v1846_v39 = vpack.c.bf16 %v4802_v0, %v4800_v21 }
 0x9fa   : > { %2025 = vmatmul.bf16.vlgmr.msrb.gmra.mxu1 %v1846_v39  ;;  %2039 = vmatmul.bf16.vlgmr.msra.gmra.mxu2 %v1846_v39 }
 0x9fb   : > { %2053 = vmatmul.bf16.vlgmr.msrb.gmra.mxu3 %v1846_v39 }
 0xa77   : > { %v2026_v22 = vpop.f32.mrf.mxu1 }
 0xa78   : > { %v2027_v27 = vadd.f32 %v2026_v22, %v1883_v23 }
 0xa7d   : > { %v2040_v24 = vpop.f32.mrf.mxu2 }
 0xa7e   : > { %v2054_v25 = vpop.f32.mrf.mxu3  ;;  %v2041_v36 = vadd.f32 %v2040_v24, %v1884_v30 }
 0xa7f   : > { %v2028_v26 = vpop.f32.mrf.mxu1  ;;  %v2055_v40 = vadd.f32 %v2054_v25, %v1885_v33 }
 0xa80   : > { %v2029_v29 = vadd.f32 %v2028_v26, %v1883_v23 }
 0xa82   : > { %v2059_v32 = vpack.c.bf16 %v2029_v29, %v2027_v27 }
 0xa84   : > { %2127 = vrot.lane.b32.xlu2 %v2059_v32, %s4375_s1 }
 0xa85   : > { %v2042_v34 = vpop.f32.mrf.mxu2 }
 0xa86   : > { %v2043_v37 = vadd.f32 %v2042_v34, %v1884_v30  ;;  %v2056_v38 = vpop.f32.mrf.mxu3 }
 0xa87   : > { %v2057_v41 = vadd.f32 %v2056_v38, %v1885_v33 }
 0xa88   : > { %v2060_v35 = vpack.c.bf16 %v2043_v37, %v2041_v36 }
 0xa89   : > { %v2061_v44 = vpack.c.bf16 %v2057_v41, %v2055_v40 }
 0xa8a   : > { %2130 = vrot.lane.b32.xlu1 %v2060_v35, %s4375_s1  ;;  %v2066_v17 = vsel %vm1173_vm10, %v2060_v35, 0 }
 0xa8b   : > { %2119 = vmatpush.bf16.msra.mxu1 %v2061_v44  ;;  %2075 = vmatpush.bf16.xpose.msrb.mxu0 %v2066_v17  ;;  %v3682_v17 = vld [vmem:[#allocation11 + $0x70] sm:$0xff] }
 0xa92   : > { %3400 = vmatmul.msk.bf16.vlgmr.msrb.gmra.mxu0 %vm1173_vm10, %v2059_v32 }
 0xade   : > { %v2128_v47 = vpop.permute.xlu2 %2127 }
 0xafc   : > { %v2131_v45 = vpop.permute.xlu1 %2130 }
 0xafd   : > { %v2136_v46 = vsel %vm1173_vm10, %v2131_v45, 0  ;;  %v3681_v45 = vld [vmem:[#allocation11 + $0x68] sm:$0xff] }
 0xafe   : > { %2145 = vmatpush.bf16.xpose.msrb.mxu2 %v2136_v46  ;;  %v3680_v46 = vld [vmem:[#allocation11 + $0x60] sm:$0xff] }
 0xb05   : > { %3402 = vmatmul.msk.bf16.vlgmr.msrb.gmra.mxu2 %vm1173_vm10, %v2128_v47  ;;  %v3679_v47 = vld [vmem:[#allocation11 + $0x58] sm:$0xff] }
 0xb0f   : > { %v2077_v48 = vpop.f32.mrf.mxu0 }
 0xb10   : > { %v2082_v49 = vmul.f32 0.125, %v2077_v48  ;;  %v3678_v48 = vld [vmem:[#allocation11 + $0x50] sm:$0xff] }
 0xb12   : > { %v2084_v50 = vadd.f32 %v4727_v43, %v2082_v49  ;;  %v3677_v49 = vld [vmem:[#allocation11 + $0x48] sm:$0xff] }
 0xb14   : > { %v2086_v51 = vsel %vm1201_vm11, %v2084_v50, -inf }
 0xb15   : > { %2087 = vmax.xlane.f32.xlu1 %v2086_v51 }
 0xb17   : > { %v2079_v58 = vpop.f32.mrf.mxu0 }
 0xb18   : > { %v2083_v61 = vmul.f32 0.125, %v2079_v58 }
 0xb1a   : > { %v2085_v11 = vadd.f32 %v3966_v63, %v2083_v61 }
 0xb1c   : > { %v2089_v12 = vsel %vm1201_vm11, %v2085_v11, -inf }
 0xb88   : > { %v2147_v52 = vpop.f32.mrf.mxu2  ;;  %v2088_v60 = vpop.xlane.xlu1 %2087 }
 0xb89   : > { %v2152_v53 = vmul.f32 0.125, %v2147_v52  ;;  %v2092_v18 = vsub.f32 %v2084_v50, %v2088_v60  ;;  %v3676_v50 = vld [vmem:[#allocation11 + $0x40] sm:$0xff]  ;;  %v3696_v60 = vld [vmem:[#allocation16 + $0xe4] sm:$0xf] }
 0xb8b   : > { %v2154_v54 = vadd.f32 %v4727_v43, %v2152_v53  ;;  %v2094_v19 = vmul.f32 1.442695, %v2092_v18 }
 0xb8d   : > { %v2156_v55 = vsel %vm1201_vm11, %v2154_v54, -inf }
 0xb8e   : > { %2157 = vmax.xlane.f32.xlu0 %v2156_v55 }
 0xb90   : > { %v2149_v56 = vpop.f32.mrf.mxu2 }
 0xb91   : > { %v2153_v57 = vmul.f32 0.125, %v2149_v56 }
 0xb93   : > { %v2155_v59 = vadd.f32 %v4727_v43, %v2153_v57 }
 0xb95   : > { %v2159_v62 = vsel %vm1201_vm11, %v2155_v59, -inf }
 0xb96   : > { %2160 = vmax.xlane.f32.xlu0 %v2159_v62 }
 0xb9e   : > { %2090 = vmax.xlane.f32.xlu0 %v2089_v12 }
 0xc01   : > { %v2158_v1 = vpop.xlane.xlu0 %2157 }
 0xc02   : > { %v2162_v2 = vsub.f32 %v2154_v54, %v2158_v1 }
 0xc04   : > { %v2164_v3 = vmul.f32 1.442695, %v2162_v2 }
 0xc06   : > { %3934 = vpow2.f32 %v2164_v3 }
 0xc09   : > { %v2161_v4 = vpop.xlane.xlu0 %2160 }
 0xc0a   : > { %v2163_v5 = vsub.f32 %v2155_v59, %v2161_v4  ;;  %v3890_v59 = vld [vmem:[#allocation13 + $0x1] ss:$0 sm:$0xff] }
 0xc0c   : > { %v3935_v6 = vpop.eup %3934  ;;  %v2166_v7 = vmul.f32 1.442695, %v2163_v5 }
 0xc0d   : > { %v2168_v43 = vsel %vm1201_vm11, %v3935_v6, 0.0 }
 0xc0e   : > { %3936 = vpow2.f32 %v2166_v7  ;;  %2169 = vadd.xlane.f32.xlu2 %v2168_v43 }
 0xc11   : > { %v2091_v8 = vpop.xlane.xlu0 %2090 }
 0xc12   : > { %v2093_v9 = vsub.f32 %v2085_v11, %v2091_v8  ;;  %v3699_v8 = vld [vmem:[#allocation16 + $0xf4] sm:$0xf0] }
 0xc14   : > { %v3937_v10 = vpop.eup %3936  ;;  %v2096_v14 = vmul.f32 1.442695, %v2093_v9  ;;  %v3698_v9 = vld [vmem:[#allocation16 + $0xf4] sm:$0xf] }
 0xc15   : > { %v2171_v31 = vsel %vm1201_vm11, %v3937_v10, 0.0 }
 0xc16   : > { %3938 = vpow2.f32 %v2096_v14  ;;  %2172 = vadd.xlane.f32.xlu0 %v2171_v31  ;;  %v3498_v14 = vld [vmem:[#allocation16 + $0xf8] sm:$0xf0] }
 0xc17   : > { %3940 = vpow2.f32 %v2094_v19  ;;  %v3501_v31 = vor.u32 %v3698_v9, %v3498_v14  ;;  %v3490_v19 = vld [vmem:[#allocation16 + $0xe8] sm:$0xf0] }
 0xc19   : > { %2470 = vmatpush.bf16.msra.mxu2 %v3501_v31 }
 0xc1c   : > { %v3939_v15 = vpop.eup %3938 }
 0xc1d   : > { %v2101_v16 = vsel %vm1201_vm11, %v3939_v15, 0.0  ;;  %v3941_v20 = vpop.eup %3940 }
 0xc1e   : > { %2102 = vadd.xlane.f32.xlu1 %v2101_v16  ;;  %v2098_v39 = vsel %vm1201_vm11, %v3941_v20, 0.0  ;;  %v3697_v16 = vld [vmem:[#allocation16 + $0xe4] sm:$0xf0] }
 0xc2a   : > { %2180 = vrot.lane.b32.xlu0 %v2061_v44, %s4375_s1  ;;  %v3683_v44 = vld [vmem:[#allocation11 + $0x78] sm:$0xff] }
 0xc2b   : > { %2281 = vmatpush.bf16.msra.mxu0 %v3683_v44  ;;  %v3689_v44 = vld [vmem:[#allocation16 + $0xa4] sm:$0xf0] }
 0xc2f   : > { %2282 = vmatpush.bf16.msra.mxu0 %v3682_v17  ;;  %v3688_v17 = vld [vmem:[#allocation16 + $0xa4] sm:$0xf] }
 0xc33   : > { %2283 = vmatpush.bf16.msra.mxu0 %v3681_v45 }
 0xc37   : > { %2284 = vmatpush.bf16.msra.mxu0 %v3680_v46  ;;  %v3458_v46 = vld [vmem:[#allocation16 + $0xa8] sm:$0xf0] }
 0xc3b   : > { %2285 = vmatpush.bf16.msra.mxu0 %v3679_v47  ;;  %v3461_v47 = vor.u32 %v3688_v17, %v3458_v46 }
 0xc3f   : > { %2286 = vmatpush.bf16.msra.mxu0 %v3678_v48  ;;  %v3448_v48 = vld [vmem:[#allocation16 + $0x90] sm:$0xf] }
 0xc43   : > { %2287 = vmatpush.bf16.msra.mxu0 %v3677_v49  ;;  %v3687_v49 = vld [vmem:[#allocation16 + $0x94] sm:$0xf0] }
 0xc47   : > { %2288 = vmatpush.bf16.msra.mxu0 %v3676_v50  ;;  %v3686_v50 = vld [vmem:[#allocation16 + $0x94] sm:$0xf] }
 0xc54   : > { %2099 = vadd.xlane.f32.xlu0 %v2098_v39  ;;  %v3480_v39 = vld [vmem:[#allocation16 + $0xd0] sm:$0xf] }
 0xc81   : > { %v2170_v42 = vpop.xlane.xlu2 %2169 }
 0xc89   : > { %v2173_v22 = vpop.xlane.xlu0 %2172 }
 0xc8a   : > { %3942 = vrcp.f32 %v2173_v22  ;;  %v3695_v22 = vld [vmem:[#allocation16 + $0xd4] sm:$0xf0] }
 0xc8b   : > { %3944 = vrcp.f32 %v2170_v42  ;;  %v3694_v42 = vld [vmem:[#allocation16 + $0xd4] sm:$0xf] }
 0xc90   : > { %v3943_v23 = vpop.eup %3942 }
 0xc91   : > { %v3945_v24 = vpop.eup %3944  ;;  %v2177_v25 = vmul.f32 %v3943_v23, %v3937_v10  ;;  %v2103_v30 = vpop.xlane.xlu1 %2102  ;;  %v3481_v23 = vor.u32 %v3695_v22, %v3480_v39  ;;  %v3892_v39 = vld [vmem:[#allocation14 + $0x1] ss:$0 sm:$0xff] }
 0xc92   : > { %v2176_v26 = vmul.f32 %v3945_v24, %v3935_v6  ;;  %3946 = vrcp.f32 %v2103_v30  ;;  %v3482_v24 = vld [vmem:[#allocation16 + $0xd8] sm:$0xf0] }
 0xc94   : > { %v2178_v29 = vpack.c.bf16 %v2177_v25, %v2176_v26  ;;  %v3485_v25 = vor.u32 %v3694_v42, %v3482_v24  ;;  %v3472_v26 = vld [vmem:[#allocation16 + $0xc0] sm:$0xf]  ;;  %v3707_v24 = vld [vmem:[#allocation17 + $0xb8] sm:$0xff] }
 0xc98   : > { %v3947_v33 = vpop.eup %3946 }
 0xc99   : > { %v2107_v36 = vmul.f32 %v3947_v33, %v3939_v15  ;;  %v3488_v15 = vld [vmem:[#allocation16 + $0xe0] sm:$0xf] }
 0xc9a   : > { %v3489_v18 = vor.u32 %v3697_v16, %v3488_v15  ;;  %v3891_v16 = vld [vmem:[%s4931_s11 + $0x1] ss:$0 sm:$0xff] }
 0xc9c   : > { %v2181_v27 = vpop.permute.xlu0 %2180 }
 0xc9d   : > { %2193 = vmatpush.bf16.msra.mxu3 %v2181_v27  ;;  %v3693_v27 = vld [vmem:[#allocation16 + $0xc4] sm:$0xf0] }
 0xc9e   : > { %v3473_v30 = vor.u32 %v3693_v27, %v3472_v26  ;;  %v3715_v26 = vld [vmem:[#allocation17 + $0xf8] sm:$0xff]  ;;  %v3705_v27 = vld [vmem:[#allocation17 + $0xa8] sm:$0xff] }
 0xc9f   : > { %2670 = vmatpush.bf16.msrb.mxu0 %v3715_v26 }
 0xca0   : > { %3403 = vmatmul.msk.bf16.vlgmr.msra.gmra.mxu3 %vm1201_vm11, %v2178_v29  ;;  %v3692_v29 = vld [vmem:[#allocation16 + $0xc4] sm:$0xf] }
 0xca1   : > { %2656 = vmatpush.bf16.msrb.mxu3 %v3707_v24 }
 0xcc7   : > { %v2100_v32 = vpop.xlane.xlu0 %2099 }
 0xcc8   : > { %3948 = vrcp.f32 %v2100_v32  ;;  %v3474_v32 = vld [vmem:[#allocation16 + $0xc8] sm:$0xf0] }
 0xcc9   : > { %v3477_v33 = vor.u32 %v3692_v29, %v3474_v32  ;;  %v3704_v29 = vld [vmem:[#allocation17 + $0xa0] sm:$0xff]  ;;  %v3703_v32 = vld [vmem:[#allocation17 + $0x98] sm:$0xff] }
 0xcce   : > { %v3949_v34 = vpop.eup %3948 }
 0xccf   : > { %v2106_v37 = vmul.f32 %v3949_v34, %v3941_v20  ;;  %v3493_v20 = vor.u32 %v3696_v60, %v3490_v19  ;;  %v3464_v34 = vld [vmem:[#allocation16 + $0xb0] sm:$0xf] }
 0xcd1   : > { %v2108_v38 = vpack.c.bf16 %v2107_v36, %v2106_v37  ;;  %2471 = vmatpush.bf16.msra.mxu2 %v3493_v20  ;;  %v3691_v36 = vld [vmem:[#allocation16 + $0xb4] sm:$0xf0]  ;;  %v3690_v37 = vld [vmem:[#allocation16 + $0xb4] sm:$0xf] }
 0xcd3   : > { %3401 = vmatmul.msk.bf16.vlgmr.msra.gmra.mxu1 %vm1201_vm11, %v2108_v38  ;;  %v3465_v38 = vor.u32 %v3691_v36, %v3464_v34  ;;  %v3702_v34 = vld [vmem:[#allocation17 + $0x90] sm:$0xff]  ;;  %v3437_v36 = vld [vmem:[%s4934_s14 + $0x2] sm:$0x3] }
 0xcd5   : > { %2472 = vmatpush.bf16.msra.mxu2 %v3485_v25  ;;  %v3706_v25 = vld [vmem:[#allocation17 + $0xb0] sm:$0xff] }
 0xcd6   : > { %2657 = vmatpush.bf16.msrb.mxu3 %v3706_v25 }
 0xcd9   : > { %2473 = vmatpush.bf16.msra.mxu2 %v3477_v33  ;;  %v3712_v33 = vld [vmem:[#allocation17 + $0xe0] sm:$0xff] }
 0xcda   : > { %2658 = vmatpush.bf16.msrb.mxu3 %v3705_v27 }
 0xcde   : > { %2659 = vmatpush.bf16.msrb.mxu3 %v3704_v29  ;;  %v3893_v29 = vld [vmem:[%s4985_s23 + $0x1] ss:$0 sm:$0xff] }
 0xce2   : > { %2660 = vmatpush.bf16.msrb.mxu3 %v3703_v32 }
 0xce6   : > { %2661 = vmatpush.bf16.msrb.mxu3 %v3702_v34 }
 0xd23   : > { %v2195_v40 = vpop.f32.mrf.mxu3 }
 0xd2b   : > { %v2197_v41 = vpop.f32.mrf.mxu3 }
 0xd2c   : > { %v3875_v35 = vpack.i.bf16 %v2197_v41, %v2195_v40  ;;  %v3466_v40 = vld [vmem:[#allocation16 + $0xb8] sm:$0xf0] }
 0xd2d   : > { %v3469_v41 = vor.u32 %v3690_v37, %v3466_v40  ;;  %v3711_v37 = vld [vmem:[#allocation17 + $0xd8] sm:$0xff]  ;;  %v2372_v40 = vperm.slane %v3437_v36, 0 }
 0xd2e   : > { %3876 = vrot.lane.b32.xlu2 %v3875_v35, %s4375_s1  ;;  %v3456_v35 = vld [vmem:[#allocation16 + $0xa0] sm:$0xf]  ;;  %s800_s1 = scalar_lea.vmem %s4988_s28, %s3578_s7  ;;  %s4989_s28 = sld [smem:[#allocation41_spill]] }
 0xd2f   : > { %2474 = vmatpush.bf16.msra.mxu2 %v3469_v41  ;;  %v3457_v45 = vor.u32 %v3689_v44, %v3456_v35  ;;  %v3710_v41 = vld [vmem:[#allocation17 + $0xd0] sm:$0xff]  ;;  %v3700_v44 = vld [vmem:[#allocation17 + $0x80] sm:$0xff]  ;;  %s2798_s7 = sshll.u32 %s790_s5, 4  ;;  %s2799_s7 = int_to_ptr.vmem [resolvable:$true] %s2798_s7 }
 0xd33   : > { %2475 = vmatpush.bf16.msra.mxu2 %v3461_v47  ;;  %v2373_v47 = vperm.slane %v3437_v36, 1 }
 0xd50   : > { %v2121_v51 = vpop.f32.mrf.mxu1 }
 0xd58   : > { %v2123_v55 = vpop.f32.mrf.mxu1 }
 0xd88   : > { %v3877_v52 = vpop.permute.xlu2 %3876 }
 0xd89   : > { %v3879_v53 = vunpack.i.h.bf16 %v3877_v52  ;;  %v3878_v54 = vunpack.i.l.bf16 %v3877_v52  ;;  %v3450_v52 = vld [vmem:[#allocation16 + $0x98] sm:$0xf0] }
 0xd8b   : > { %v2208_v56 = vsel %vm1173_vm10, %v2121_v51, %v3878_v54  ;;  %v2209_v57 = vsel %vm1173_vm10, %v2123_v55, %v3879_v53  ;;  %v3449_v51 = vor.u32 %v3687_v49, %v3448_v48  ;;  %v3440_v53 = vld [vmem:[#allocation16 + $0x80] sm:$0xf]  ;;  %v3685_v54 = vld [vmem:[#allocation16 + $0x84] sm:$0xf0] }
 0xd8c   : > { %v2210_v58 = vpack.c.bf16 %v2209_v57, %v2208_v56  ;;  %v3453_v56 = vor.u32 %v3686_v50, %v3450_v52  ;;  %v3684_v57 = vld [vmem:[#allocation16 + $0x84] sm:$0xf] }
 0xd8d   : > { %v3708_v50 = vld [vmem:[#allocation17 + $0xc0] sm:$0xff] }
 0xd8e   : > { %2289 = vmatmul.bf16.vlgmr.msra.gmra.mxu0 %v2210_v58  ;;  %v3442_v58 = vld [vmem:[#allocation16 + $0x88] sm:$0xf0]  ;;  %2476 = vmatpush.bf16.msra.mxu2 %v3453_v56 }
 0xe0b   : > { %v2290_v61 = vpop.f32.mrf.mxu0 }
 0xe0c   : > { %v2291_v62 = vadd.f32 %v3890_v59, %v2290_v61  ;;  %v3441_v61 = vor.u32 %v3685_v54, %v3440_v53 }
 0xe0e   : > { %v2295_v63 = vadd.f32 %v2291_v62, %v4800_v21  ;;  %v3445_v62 = vor.u32 %v3684_v57, %v3442_v58 }
 0xe10   : > { %2301 = vadd.xlane.f32.xlu1 %v2295_v63  ;;  %2477 = vmatpush.bf16.msra.mxu2 %v3445_v62 }
 0xe13   : > { %v2292_v11 = vpop.f32.mrf.mxu0 }
 0xe14   : > { %v2293_v12 = vadd.f32 %v3890_v59, %v2292_v11 }
 0xe16   : > { %v2296_v1 = vadd.f32 %v2293_v12, %v4802_v0  ;;  %v3496_v0 = vld [vmem:[#allocation16 + $0xf0] sm:$0xf] }
 0xe17   : > { %v3497_v10 = vor.u32 %v3699_v8, %v3496_v0 }
 0xe18   : > { %2303 = vadd.xlane.f32.xlu1 %v2296_v1 }
 0xe19   : > { %2456 = vmatpush.bf16.msrb.mxu1 %v3497_v10 }
 0xe1d   : > { %2457 = vmatpush.bf16.msrb.mxu1 %v3489_v18 }
 0xe21   : > { %2458 = vmatpush.bf16.msrb.mxu1 %v3481_v23 }
 0xe25   : > { %2459 = vmatpush.bf16.msrb.mxu1 %v3473_v30  ;;  %v3713_v30 = vld [vmem:[#allocation17 + $0xe8] sm:$0xff] }
 0xe29   : > { %2460 = vmatpush.bf16.msrb.mxu1 %v3465_v38  ;;  %v3701_v38 = vld [vmem:[#allocation17 + $0x88] sm:$0xff] }
 0xe2a   : > { %2662 = vmatpush.bf16.msrb.mxu3 %v3701_v38 }
 0xe2d   : > { %2461 = vmatpush.bf16.msrb.mxu1 %v3457_v45  ;;  %v3709_v45 = vld [vmem:[#allocation17 + $0xc8] sm:$0xff] }
 0xe2e   : > { %2663 = vmatpush.bf16.msrb.mxu3 %v3700_v44 }
 0xe31   : > { %2462 = vmatpush.bf16.msrb.mxu1 %v3449_v51 }
 0xe35   : > { %2463 = vmatpush.bf16.msrb.mxu1 %v3441_v61 }
 0xe83   : > { %v2302_v2 = vpop.xlane.xlu1 %2301 }
 0xe84   : > { %v2305_v3 = vmul.f32 %v2302_v2, %v4694_v28 }
 0xe86   : > { %v4837_v4 = vsub.f32 %v2295_v63, %v2305_v3 }
 0xe88   : > { %v2309_v5 = vmul.f32 %v4837_v4, %v4837_v4 }
 0xe8a   : > { %2311 = vadd.xlane.f32.xlu1 %v2309_v5 }
 0xe8b   : > { %v2304_v6 = vpop.xlane.xlu1 %2303 }
 0xe8c   : > { %v2306_v7 = vmul.f32 %v2304_v6, %v4694_v28 }
 0xe8e   : > { %v4842_v43 = vsub.f32 %v2296_v1, %v2306_v7 }
 0xe90   : > { %v2310_v21 = vmul.f32 %v4842_v43, %v4842_v43 }
 0xe92   : > { %2313 = vadd.xlane.f32.xlu2 %v2310_v21 }
 0xefd   : > { %v2312_v55 = vpop.xlane.xlu1 %2311 }
 0xefe   : > { %v2315_v59 = vmul.f32 %v2312_v55, %v4694_v28 }
 0xf00   : > { %v2317_v63 = vadd.f32 1e-12, %v2315_v59 }
 0xf02   : > { %3950 = vrsqrt.f32 %v2317_v63  ;;  %vm2325_vm9 = vweird.f32 %v2317_v63 }
 0xf05   : > { %v2314_v11 = vpop.xlane.xlu2 %2313 }
 0xf06   : > { %v2316_v12 = vmul.f32 %v2314_v11, %v4694_v28 }
 0xf08   : > { %v3951_v1 = vpop.eup %3950  ;;  %v2318_v2 = vadd.f32 1e-12, %v2316_v12 }
 0xf09   : > { %v2320_v3 = vmul.f32 %v3951_v1, %v2317_v63  ;;  %vm2326_vm8 = vweird.f32 %v3951_v1 }
 0xf0a   : > { %3952 = vrsqrt.f32 %v2318_v2  ;;  %vm2327_vm10 = vmor %vm2325_vm9, %vm2326_vm8  ;;  %vm2335_vm13 = vweird.f32 %v2318_v2 }
 0xf0b   : > { %v2321_v5 = vmul.f32 %v3951_v1, %v2320_v3 }
 0xf0d   : > { %v2322_v6 = vmul.f32 0.5, %v2321_v5 }
 0xf0f   : > { %v2323_v7 = vsub.f32 1.5, %v2322_v6 }
 0xf10   : > { %v3953_v21 = vpop.eup %3952 }
 0xf11   : > { %v2324_v0 = vmul.f32 %v3951_v1, %v2323_v7  ;;  %v2330_v8 = vmul.f32 %v3953_v21, %v2318_v2  ;;  %vm2336_vm12 = vweird.f32 %v3953_v21 }
 0xf12   : > { %vm2337_vm14 = vmor %vm2335_vm13, %vm2336_vm12 }
 0xf13   : > { %v2331_v9 = vmul.f32 %v3953_v21, %v2330_v8  ;;  %v2328_v10 = vsel %vm2327_vm10, %v3951_v1, %v2324_v0 }
 0xf14   : > { %v2339_v15 = vmul.f32 %v2328_v10, %v4837_v4 }
 0xf15   : > { %v2332_v14 = vmul.f32 0.5, %v2331_v9 }
 0xf16   : > { %v2344_v20 = vmul.f32 %v3891_v16, %v2339_v15 }
 0xf17   : > { %v2333_v31 = vsub.f32 1.5, %v2332_v14 }
 0xf18   : > { %v4853_v42 = vadd.f32 %v3892_v39, %v2344_v20 }
 0xf19   : > { %v2334_v60 = vmul.f32 %v3953_v21, %v2333_v31 }
 0xf1b   : > { %v2338_v18 = vsel %vm2337_vm14, %v3953_v21, %v2334_v60 }
 0xf1c   : > { %v2340_v19 = vmul.f32 %v2338_v18, %v4842_v43  ;;  %v3714_v43 = vld [vmem:[#allocation17 + $0xf0] sm:$0xff] }
 0xf1d   : > { %2671 = vmatpush.bf16.msrb.mxu0 %v3714_v43 }
 0xf1e   : > { %v2345_v22 = vmul.f32 %v3891_v16, %v2340_v19 }
 0xf20   : > { %v4855_v23 = vadd.f32 %v3892_v39, %v2345_v22 }
 0xf21   : > { %2672 = vmatpush.bf16.msrb.mxu0 %v3713_v30 }
 0xf22   : > { %v2351_v4 = vpack.c.bf16 %v4855_v23, %v4853_v42 }
 0xf24   : > { %2464 = vmatmul.bf16.vlgmr.msrb.gmra.mxu1 %v2351_v4  ;;  %2478 = vmatmul.bf16.vlgmr.msra.gmra.mxu2 %v2351_v4 }
 0xf25   : > { %2673 = vmatpush.bf16.msrb.mxu0 %v3712_v33 }
 0xf29   : > { %2674 = vmatpush.bf16.msrb.mxu0 %v3711_v37 }
 0xf2d   : > { %2675 = vmatpush.bf16.msrb.mxu0 %v3710_v41 }
 0xf31   : > { %2676 = vmatpush.bf16.msrb.mxu0 %v3709_v45 }
 0xf35   : > { %2677 = vmatpush.bf16.msrb.mxu0 %v3708_v50  ;;  %v2741_v50 = vld [vmem:[%s800_s1 + $0x8] sm:$0xff] }
 0xfa1   : > { %v2465_v35 = vpop.f32.mrf.mxu1 }
 0xfa2   : > { %v2466_v17 = vadd.f32 %v2465_v35, %v2372_v40 }
 0xfa4   : > { %v2484_v46 = vmul.f32 %v2466_v17, %v2466_v17 }
 0xfa6   : > { %v2488_v48 = vmul.f32 %v2484_v46, %v2466_v17 }
 0xfa7   : > { %v2479_v49 = vpop.f32.mrf.mxu2 }
 0xfa8   : > { %v2492_v51 = vmul.f32 0.044715, %v2488_v48  ;;  %v2480_v52 = vadd.f32 %v2479_v49, %v2373_v47 }
 0xfa9   : > { %v2467_v53 = vpop.f32.mrf.mxu1 }
 0xfaa   : > { %v2496_v54 = vadd.f32 %v2492_v51, %v2466_v17  ;;  %v2485_v55 = vmul.f32 %v2480_v52, %v2480_v52  ;;  %v2468_v56 = vadd.f32 %v2467_v53, %v2372_v40 }
 0xfac   : > { %v2500_v57 = vmul.f32 0.7978846, %v2496_v54  ;;  %v2489_v58 = vmul.f32 %v2485_v55, %v2480_v52  ;;  %v2486_v59 = vmul.f32 %v2468_v56, %v2468_v56 }
 0xfae   : > { %v2493_v61 = vmul.f32 0.044715, %v2489_v58  ;;  %v2490_v62 = vmul.f32 %v2486_v59, %v2468_v56  ;;  %3954 = vtanh.f32 %v2500_v57 }
 0xfaf   : > { %v2481_v63 = vpop.f32.mrf.mxu2 }
 0xfb0   : > { %v2497_v11 = vadd.f32 %v2493_v61, %v2480_v52  ;;  %v2494_v12 = vmul.f32 0.044715, %v2490_v62  ;;  %v2482_v1 = vadd.f32 %v2481_v63, %v2373_v47 }
 0xfb2   : > { %v2501_v2 = vmul.f32 0.7978846, %v2497_v11  ;;  %v2498_v3 = vadd.f32 %v2494_v12, %v2468_v56  ;;  %v2487_v5 = vmul.f32 %v2482_v1, %v2482_v1 }
 0xfb4   : > { %v2502_v6 = vmul.f32 0.7978846, %v2498_v3  ;;  %v2491_v7 = vmul.f32 %v2487_v5, %v2482_v1  ;;  %3956 = vtanh.f32 %v2501_v2  ;;  %v3955_v21 = vpop.eup %3954 }
 0xfb5   : > { %v2508_v9 = vadd.f32 1.0, %v3955_v21 }
 0xfb6   : > { %3958 = vtanh.f32 %v2502_v6  ;;  %v2495_v0 = vmul.f32 0.044715, %v2491_v7 }
 0xfb7   : > { %v2512_v15 = vmul.f32 0.5, %v2508_v9 }
 0xfb8   : > { %v2499_v8 = vadd.f32 %v2495_v0, %v2482_v1 }
 0xfb9   : > { %v2516_v19 = vmul.f32 %v2512_v15, %v2466_v17  ;;  %v4376_v15 = vmov 0.0  }
 0xfba   : > { %v2503_v10 = vmul.f32 0.7978846, %v2499_v8  ;;  %v3957_v14 = vpop.eup %3956 }
 0xfbb   : > { %v2509_v60 = vadd.f32 1.0, %v3957_v14 }
 0xfbc   : > { %v3959_v31 = vpop.eup %3958  ;;  %3960 = vtanh.f32 %v2503_v10  ;;  %v3895_v10 = vld [vmem:[%s4987_s3 + $0x1] ss:$0 sm:$0xff] }
 0xfbd   : > { %v2510_v16 = vadd.f32 1.0, %v3959_v31  ;;  %v2513_v22 = vmul.f32 0.5, %v2509_v60 }
 0xfbf   : > { %v2514_v18 = vmul.f32 0.5, %v2510_v16  ;;  %v2517_v26 = vmul.f32 %v2513_v22, %v2480_v52 }
 0xfc1   : > { %v2518_v20 = vmul.f32 %v2514_v18, %v2468_v56 }
 0xfc2   : > { %v3961_v39 = vpop.eup %3960 }
 0xfc3   : > { %v2511_v4 = vadd.f32 1.0, %v3961_v39  ;;  %v2520_v24 = vpack.c.bf16 %v2518_v20, %v2516_v19 }
 0xfc5   : > { %v2515_v25 = vmul.f32 0.5, %v2511_v4  ;;  %2664 = vmatmul.bf16.vlgmr.msrb.gmra.mxu3 %v2520_v24 }
 0xfc7   : > { %v2519_v27 = vmul.f32 %v2515_v25, %v2482_v1 }
 0xfc9   : > { %v2521_v43 = vpack.c.bf16 %v2519_v27, %v2517_v26 }
 0xfcb   : > { %2678 = vmatmul.bf16.vlgmr.msrb.gmra.mxu0 %v2521_v43 }
0x1048   : > { %v2665_v30 = vpop.f32.mrf.mxu3  ;;  %v2679_v32 = vpop.f32.mrf.mxu0 }
0x1049   : > { %v2666_v33 = vadd.f32 %v3893_v29, %v2665_v30 }
0x104b   : > { %v2680_v34 = vadd.f32 %v2679_v32, %v2666_v33 }
0x104d   : > { %v2684_v36 = vadd.f32 %v2680_v34, %v4853_v42 }
0x104f   : > { %2690 = vadd.xlane.f32.xlu0 %v2684_v36 }
0x1050   : > { %v2667_v37 = vpop.f32.mrf.mxu3  ;;  %v2681_v40 = vpop.f32.mrf.mxu0 }
0x1051   : > { %v2668_v38 = vadd.f32 %v3893_v29, %v2667_v37 }
0x1053   : > { %v2682_v41 = vadd.f32 %v2681_v40, %v2668_v38 }
0x1055   : > { %v2685_v35 = vadd.f32 %v2682_v41, %v4855_v23  ;;  %v2740_v23 = vld [vmem:[%s800_s1] sm:$0xff]  ;;  %s2797_s1 = scalar_lea.hbm %s4989_s28, %s3716_s6  ;;  %s4287_s6 = scalar_lea.hbm %s4989_s28, 32 }
0x1056   : > { %s2800_s10 = sshll.u32 %s2797_s1, 4  ;;  %s2801_s10 = int_to_ptr.hbm [resolvable:$true] %s2800_s10 }
0x1057   : > { %2692 = vadd.xlane.f32.xlu1 %v2685_v35  ;;  %s4281_s3 = sshra.s32 %s2801_s10, 4  ;;  %s4282_s3 = int_to_ptr.hbm [resolvable:$true] %s4281_s3 }
0x1058   : > { %s4283_s4 = scalar_lea.hbm %s4282_s3, 16  ;;  %p4288_p8 = scmp.lt.s32.totalorder %s4282_s3, %s4989_s28 }
0x1059   : > { %p4284_p1 = scmp.ne.s32.totalorder %s4282_s3, %s4283_s4  ;;  %p4289_p7 = scmp.lt.s32.totalorder %s4287_s6, %s4283_s4 }
0x105b   : > { %p4285_p5 = pnand %p4284_p1, %p4597_p13  ;;  %p4290_p9 = por %p4289_p7, %p4288_p8 }
0x105d   : > { %p4286_p12 = pneg %p4285_p5 }
0x105f   : > { %p4291_p10 = pnand %p4290_p9, %p4286_p12 }
0x10c2   : > { %v2691_v44 = vpop.xlane.xlu0 %2690 }
0x10c3   : > { %v2694_v17 = vmul.f32 %v2691_v44, %v4694_v28 }
0x10c5   : > { %v2696_v45 = vsub.f32 %v2684_v36, %v2694_v17 }
0x10c7   : > { %v2698_v46 = vmul.f32 %v2696_v45, %v2696_v45 }
0x10c9   : > { %2700 = vadd.xlane.f32.xlu0 %v2698_v46 }
0x10ca   : > { %v2693_v47 = vpop.xlane.xlu1 %2692 }
0x10cb   : > { %v2695_v48 = vmul.f32 %v2693_v47, %v4694_v28 }
0x10cd   : > { %v2697_v49 = vsub.f32 %v2685_v35, %v2695_v48 }
0x10cf   : > { %v2699_v42 = vmul.f32 %v2697_v49, %v2697_v49 }
0x10d1   : > { %2702 = vadd.xlane.f32.xlu1 %v2699_v42 }
0x10dd   : > { %2746 = vperm.xlu0 %3869, %v2741_v50  }
0x10ea   : > { %2743 = vperm.xlu1 %3880, %v2740_v23  }
0x113c   : > { %v2701_v51 = vpop.xlane.xlu0 %2700 }
0x113d   : > { %v2704_v52 = vmul.f32 %v2701_v51, %v4694_v28 }
0x113f   : > { %v2706_v53 = vadd.f32 1e-12, %v2704_v52 }
0x1141   : > { %3962 = vrsqrt.f32 %v2706_v53  ;;  %vm2714_vm0 = vweird.f32 %v2706_v53 }
0x1144   : > { %v2703_v54 = vpop.xlane.xlu1 %2702 }
0x1145   : > { %v2705_v55 = vmul.f32 %v2703_v54, %v4694_v28  ;;  %v3894_v28 = vld [vmem:[%s4986_s22 + $0x1] ss:$0 sm:$0xff] }
0x1147   : > { %v3963_v56 = vpop.eup %3962  ;;  %v2707_v57 = vadd.f32 1e-12, %v2705_v55 }
0x1148   : > { %v2709_v58 = vmul.f32 %v3963_v56, %v2706_v53  ;;  %vm2715_vm15 = vweird.f32 %v3963_v56 }
0x1149   : > { %3964 = vrsqrt.f32 %v2707_v57  ;;  %vm2716_vm1 = vmor %vm2714_vm0, %vm2715_vm15  ;;  %vm2724_vm3 = vweird.f32 %v2707_v57 }
0x114a   : > { %v2710_v59 = vmul.f32 %v3963_v56, %v2709_v58 }
0x114c   : > { %v2711_v61 = vmul.f32 0.5, %v2710_v59 }
0x114e   : > { %v2712_v62 = vsub.f32 1.5, %v2711_v61 }
0x114f   : > { %v3965_v63 = vpop.eup %3964  ;;  %v2747_v18 = vpop.permute.xlu0 %2746 }
0x1150   : > { %v2719_v11 = vmul.f32 %v3965_v63, %v2707_v57  ;;  %v2713_v12 = vmul.f32 %v3963_v56, %v2712_v62  ;;  %vm2725_vm2 = vweird.f32 %v3965_v63  ;;  %vm2749_vm6 = vcmp.eq.s32.totalorder %v2747_v18, %v4690_v13 }
0x1151   : > { %vm2726_vm4 = vmor %vm2724_vm3, %vm2725_vm2  ;;  %v3570_v19 = vsel %vm2749_vm6, 1.0, %v4376_v15 }
0x1152   : > { %v2720_v1 = vmul.f32 %v3965_v63, %v2719_v11  ;;  %v2717_v3 = vsel %vm2716_vm1, %v3963_v56, %v2713_v12 }
0x1153   : > { %v2728_v7 = vmul.f32 %v2717_v3, %v2696_v45 }
0x1154   : > { %v2721_v2 = vmul.f32 0.5, %v2720_v1 }
0x1155   : > { %v2733_v14 = vmul.f32 %v3894_v28, %v2728_v7 }
0x1156   : > { %v2722_v5 = vsub.f32 1.5, %v2721_v2 }
0x1157   : > { %v2738_v60 = vadd.f32 %v3895_v10, %v2733_v14 }
0x1158   : > { %v2723_v6 = vmul.f32 %v3965_v63, %v2722_v5 }
0x115a   : > { %v2727_v21 = vsel %vm2726_vm4, %v3965_v63, %v2723_v6 }
0x115b   : > { %v2729_v0 = vmul.f32 %v2727_v21, %v2697_v49 }
0x115c   : > { %v2744_v8 = vpop.permute.xlu1 %2743 }
0x115d   : > { %v2734_v9 = vmul.f32 %v3894_v28, %v2729_v0  ;;  %vm2748_vm5 = vcmp.eq.s32.totalorder %v2744_v8, %v4690_v13 }
0x115e   : > { %v3569_v16 = vsel %vm2748_vm5, 1.0, %v4376_v15 }
0x115f   : > { %v2739_v31 = vadd.f32 %v3895_v10, %v2734_v9 }
0x1161   : > { %2774 = vmatpush.msra.mxu1 %v2739_v31 }
0x1163   : > { %2775 = vmatpush.msra.mxu1 %v2738_v60 }
0x1164   : > { %3571 = vmatmul.msk.f32.vlgmr.msra.gmra.mxu1 %vm1201_vm11, %v3569_v16 }
0x116c   : > { %3572 = vmatmul.msk.f32.gmra.mxu1 %vm1201_vm11, %v3570_v19 }
0x11e1   : > { %v2777_v20 = vpop.f32.mrf.mxu1 }
0x11e2   : > { %2783 = vst [vmem:[%s790_s5] sm:$0xff] %v2777_v20 }
0x11e9   : > { %v2780_v39 = vpop.f32.mrf.mxu1 }
0x11ea   : > { %2784 = vst [vmem:[%s790_s5 + $0x8] sm:$0xff] %v2780_v39 }
0x11eb   : > { %4294 = shalt.err (!%p4291_p10)
}
0x11ec   : > { %s4377_s29 = smov 128   ;;  %s4378_s2 = smov 8  }
0x11ed   : > { %3755 = dma.vmem_to_hbm [thread:$0]  (%p4597_p13), %s2799_s7, 256, %s2801_s10, %s2786_s25, %s4377_s29, %s4377_s29, %s4378_s2  }
0x11ee PF: > { %s2815_s1 = sand.u32 1, %s4341_s0   ;;  %p4990_p11 = scmp.ge.s32.totalorder %s4353_s21, 2 }
0x11ef   : > { %s2816_s8 = scalar_lea.sflag [#allocation4], %s2815_s1 }
0x11f0   : > { %p3790_p0 = pnand %p4990_p11, %p4602_p4 }
0x11f2   : > { %p3791_p2 = pneg %p3790_p0 }
0x11f4   : > { %4336 = dma.done.wait (%p3791_p2), %s2816_s8, 256  }
0x11f5   : > { %4338 = vsyncadd (%p3791_p2), %s2816_s8, 4294967040  ;;  %p37_p6 = scmp.ge.s32.totalorder %s4577_s27, 4   ;;  %s4991_s0 = smov %s4345_s30 }
0x11f6   : > { %s4992_s30 = smov %s4349_s20  ;;  %s4993_s20 = smov %s4589_s26 }
0x11f7   : > { %s4994_s21 = smov %s4577_s27  ;;  %39 = sbr.rel (!%p37_p6) target bundleno = 26 (0x1a), region = 195 }
0x11fc   :  { %2822 = vsyncpa [#allocation3], 1 }
0x11fd   :  { %2824 = vsyncpa [#allocation3 + $0x1], 1 }
0x11fe   :  { %2825 = vsyncpa [#allocation6], 1 }
0x11ff   :  { %2826 = vsyncpa [#allocation9], 1 }
0x1200   :  { %2827 = vsyncpa [#allocation12], 1 }
0x1201   :  { %2828 = vsyncpa [#allocation15], 1 }
0x1202   :  { %2829 = vsyncpa [#allocation18], 1 }
0x1203   :  { %2830 = vsyncpa [#allocation4], 1 }
0x1204   :  { %2832 = vsyncpa [#allocation4 + $0x1], 1 }

</bundles_post_ra>
